<compile_context>
chip_gen: v7x
topology: tpu7x:2x2x1
jax: 0.10.0
libtpu: 0.0.40
codegen_flags: <defaults>
</compile_context>

<pallas_src>
import functools

import jax
import jax.numpy as jnp
from jax import lax
from jax.experimental import pallas as pl
from jax.experimental.pallas import tpu as pltpu


# ----------------------------- Pallas kernel ------------------------------- #
def graph_classifier_kernel(heads_ref, tails_ref, esrc_ref, edst_ref,
                            etype_ref, rlab_ref, relvec_ref,
                            w1_ref, b1_ref, w2_ref, b2_ref,
                            wrs_ref, brs_ref, wcs_ref, bc_ref,
                            wf_ref, bf_ref,
                            out_ref, hist_ref, *, R):
    f32 = jnp.float32
    bf16 = jnp.bfloat16

    ei = pl.program_id(1)
    ne = pl.num_programs(1)

    TB = heads_ref.shape[0]           # batch tile
    TE = esrc_ref.shape[1]            # edge tile
    Rp = hist_ref.shape[1]            # padded (R + ones-row) width

    # ----------------- per-E-tile: histogram accumulation ------------------ #
    heads = heads_ref[...]            # (TB, 1) int32
    tails = tails_ref[...]            # (TB, 1) int32
    esrc = esrc_ref[...]              # (1, TE) int32
    edst = edst_ref[...]              # (1, TE) int32

    # connectivity masks built from indices (VPU compares; values are 0/1)
    ieo = (edst == heads).astype(f32)     # in-edges of head   (TB, TE)
    oeo = (esrc == heads).astype(f32)     # out-edges of head
    iei = (edst == tails).astype(f32)     # in-edges of tail
    oei = (esrc == tails).astype(f32)     # out-edges of tail
    m5 = oeo * iei                        # head -> tail edges
    m6 = ieo * oei                        # tail -> head edges
    conn = jnp.concatenate(
        [ieo - m6, oeo - m5, iei - m5, oei - m6, m5, m6],
        axis=0).astype(bf16)              # (6*TB, TE), exact 0/1 in bf16

    # lane-dense relation one-hot (Rp, TE) with an all-ones row at index R
    etyp = etype_ref[...]                                          # (1, TE)
    rid = lax.broadcasted_iota(jnp.int32, (Rp, TE), 0)
    onehot = jnp.where(jnp.logical_or(rid == etyp, rid == R),
                       1.0, 0.0).astype(bf16)                      # (Rp, TE)

    # histogram + folded row-sum (column R), single MXU call, f32 accumulate
    tile_hist = lax.dot_general(conn, onehot, (((1,), (1,)), ((), ())),
                                preferred_element_type=f32)        # (6*TB, Rp)

    @pl.when(ei == 0)
    def _():
        hist_ref[...] = jnp.zeros_like(hist_ref)

    hist_ref[...] += tile_hist

    # ------------------------------ epilogue -------------------------------- #
    @pl.when(ei == ne - 1)
    def _():
        hist = hist_ref[...]                            # (6*TB, Rp) f32
        rowsum = hist[:, R:R + 1]                       # (6*TB, 1)
        inv_norm = pl.reciprocal(rowsum + 1e-30, approx=False)
        bias_scale = rowsum * inv_norm                  # ~1 non-empty, 0 empty

        # transform the relation vocabulary once (Rp rows; padding rows masked)
        hv = jnp.dot(relvec_ref[...], w1_ref[...],
                     preferred_element_type=f32) + b1_ref[...]
        hv = jnp.dot(hv, w2_ref[...],
                     preferred_element_type=f32) + b2_ref[...]     # (Rp, Dp)
        vocab_ok = lax.broadcasted_iota(jnp.int32, (Rp, 1), 0) < R
        hv = jnp.where(vocab_ok, hv, 0.0)

        # aggregated neighbor embeddings (ones-column hits the zeroed hv row R)
        agg = jnp.dot(hist, hv, preferred_element_type=f32)        # (6*TB, Dp)
        scaled = agg * inv_norm

        # fused fc_reld: lane-concat the 6 mode blocks -> ONE K=6*Dp matmul
        sc = jnp.concatenate(
            [scaled[m * TB:(m + 1) * TB, :] for m in range(6)], axis=1)
        term = jnp.dot(sc, wrs_ref[...], preferred_element_type=f32)
        brs = brs_ref[...]                                          # (6, Dp)
        for m in range(6):   # folded per-mode bias: 6 tiny broadcast-FMAs
            term = term + bias_scale[m * TB:(m + 1) * TB, :] * brs[m:m + 1, :]
        neigh = term * (1.0 / 6.0)                                  # (TB, Dp)

        # relation-label embeddings: gather rows of hv via one-hot matmul
        rlab = rlab_ref[...]                                        # (TB, 1)
        onehot_r = (lax.broadcasted_iota(jnp.int32, (TB, Rp), 1)
                    == rlab).astype(f32)
        hr = jnp.dot(onehot_r, hv, preferred_element_type=f32)      # (TB, Dp)

        # fused conc: cat([neigh, hr]) @ [wc1; wc2] + bc, then relu
        nh = jnp.concatenate([neigh, hr], axis=1)                   # (TB, 2*Dp)
        z = jnp.dot(nh, wcs_ref[...], preferred_element_type=f32) + bc_ref[...]
        z = jnp.maximum(z, 0.0)

        # F.normalize(p=2, dim=-1) via rsqrt (padded cols are zero -> same norm)
        ss = jnp.sum(z * z, axis=-1, keepdims=True)
        g_rep = z * lax.rsqrt(jnp.maximum(ss, 1e-24))

        # fc_layer (padded to 128 output lanes -> unmasked full-lane store)
        out_ref[...] = (jnp.dot(g_rep, wf_ref[...], preferred_element_type=f32)
                        + bf_ref[...])


# ------------------------------ wrapper ------------------------------------ #
def _pad2(w, rows, cols):
    out = jnp.zeros((rows, cols), jnp.float32)
    return out.at[:w.shape[0], :w.shape[1]].set(w.astype(jnp.float32))


def graph_classifier_forward(edge_src, edge_dst, edge_type, rel_labels,
                             heads, tails, rel_vectors, params,
                             *, d_pad=128, v_pad=128, out_pad=128,
                             edge_tile=128, batch_tile=8):
    (w1, b1, w2, b2, wr, br, wc1, wc2, bc, wf, bf) = params
    B = int(heads.shape[0])
    E = int(edge_src.shape[0])
    R, V = rel_vectors.shape
    D = w1.shape[1]

    Rp = ((R + 1 + 7) // 8) * 8     # relation rows + ones-row, sublane multiple

    # lane-dense edge axis: dummy edges use src/dst = -1 (never match a node)
    E_pad = max(edge_tile, ((E + edge_tile - 1) // edge_tile) * edge_tile)
    pe = E_pad - E
    esrc = jnp.concatenate([edge_src.astype(jnp.int32),
                            jnp.full((pe,), -1, jnp.int32)]).reshape(1, E_pad)
    edst = jnp.concatenate([edge_dst.astype(jnp.int32),
                            jnp.full((pe,), -1, jnp.int32)]).reshape(1, E_pad)
    etyp = jnp.concatenate([edge_type.astype(jnp.int32),
                            jnp.zeros((pe,), jnp.int32)]).reshape(1, E_pad)

    # batch axis padded to the B tile (pad rows use id -2 -> match nothing)
    B_pad = ((B + batch_tile - 1) // batch_tile) * batch_tile
    pb = B_pad - B
    hds = jnp.concatenate([heads.astype(jnp.int32),
                           jnp.full((pb,), -2, jnp.int32)]).reshape(B_pad, 1)
    tls = jnp.concatenate([tails.astype(jnp.int32),
                           jnp.full((pb,), -2, jnp.int32)]).reshape(B_pad, 1)
    rlab = jnp.concatenate([rel_labels.astype(jnp.int32),
                            jnp.zeros((pb,), jnp.int32)]).reshape(B_pad, 1)

    # zero-padded and pre-stacked weights (exact: pads stay zero end-to-end)
    relvec_p = _pad2(rel_vectors, Rp, v_pad)
    w1p = _pad2(w1, v_pad, d_pad);   b1p = _pad2(b1, 1, d_pad)
    w2p = _pad2(w2, d_pad, d_pad);   b2p = _pad2(b2, 1, d_pad)
    wrs = jnp.zeros((6 * d_pad, d_pad), jnp.float32)
    for m in range(6):
        wrs = wrs.at[m * d_pad:m * d_pad + D, :D].set(wr[m])
    brs = jnp.zeros((6, d_pad), jnp.float32).at[:, :D].set(br[:, 0, :])
    wcs = jnp.zeros((2 * d_pad, d_pad), jnp.float32)
    wcs = wcs.at[:D, :D].set(wc1)
    wcs = wcs.at[d_pad:d_pad + D, :D].set(wc2)
    bcp = _pad2(bc, 1, d_pad)
    wfp = _pad2(wf, d_pad, out_pad)
    bfp = _pad2(bf, 1, out_pad)

    args = (hds, tls, esrc, edst, etyp, rlab, relvec_p,
            w1p, b1p, w2p, b2p, wrs, brs, wcs, bcp, wfp, bfp)

    TB, TE = batch_tile, edge_tile
    nb, ne = B_pad // TB, E_pad // TE

    flops = 2 * (6 * B_pad * E_pad * Rp                      # conn histogram
                 + nb * (Rp * v_pad * d_pad + Rp * d_pad * d_pad)  # vocab xform
                 + 6 * B_pad * Rp * d_pad                    # hist @ hv
                 + 6 * B_pad * d_pad * d_pad                 # fused fc_reld
                 + B_pad * Rp * d_pad                        # rel-label gather
                 + 2 * B_pad * d_pad * d_pad                 # fused conc
                 + B_pad * d_pad * out_pad)                  # fc_layer
    bytes_accessed = int(sum(a.size * a.dtype.itemsize for a in args)
                         + B_pad * out_pad * 4)

    kernel = functools.partial(graph_classifier_kernel, R=R)
    res = lambda bi, ei: (0, 0)     # resident (weight) blocks

    out = pl.pallas_call(
        kernel,
        out_shape=jax.ShapeDtypeStruct((B_pad, out_pad), jnp.float32),
        grid_spec=pltpu.PrefetchScalarGridSpec(
            num_scalar_prefetch=0,
            grid=(nb, ne),
            in_specs=[
                pl.BlockSpec((TB, 1), lambda bi, ei: (bi, 0)),      # heads
                pl.BlockSpec((TB, 1), lambda bi, ei: (bi, 0)),      # tails
                pl.BlockSpec((1, TE), lambda bi, ei: (0, ei)),      # edge src
                pl.BlockSpec((1, TE), lambda bi, ei: (0, ei)),      # edge dst
                pl.BlockSpec((1, TE), lambda bi, ei: (0, ei)),      # edge type
                pl.BlockSpec((TB, 1), lambda bi, ei: (bi, 0)),      # rel labels
                pl.BlockSpec((Rp, v_pad), res),                     # rel_vectors
                pl.BlockSpec((v_pad, d_pad), res),                  # transform1 W
                pl.BlockSpec((1, d_pad), res),                      # transform1 b
                pl.BlockSpec((d_pad, d_pad), res),                  # transform2 W
                pl.BlockSpec((1, d_pad), res),                      # transform2 b
                pl.BlockSpec((6 * d_pad, d_pad), res),              # fc_reld W stack
                pl.BlockSpec((6, d_pad), res),                      # fc_reld b stack
                pl.BlockSpec((2 * d_pad, d_pad), res),              # conc W stack
                pl.BlockSpec((1, d_pad), res),                      # conc b
                pl.BlockSpec((d_pad, out_pad), res),                # fc_layer W
                pl.BlockSpec((1, out_pad), res),                    # fc_layer b
            ],
            out_specs=pl.BlockSpec((TB, out_pad), lambda bi, ei: (bi, 0)),
            scratch_shapes=[pltpu.VMEM((6 * TB, Rp), jnp.float32)],
        ),
        compiler_params=pltpu.CompilerParams(
            dimension_semantics=("parallel", "arbitrary"),
            vmem_limit_bytes=32 * 1024 * 1024),
        cost_estimate=pl.CostEstimate(flops=flops, transcendentals=7 * B_pad,
                                      bytes_accessed=bytes_accessed),
    )(*args)
    return out[:B, :1]


# --------------------------- pure-JAX reference ----------------------------- #
def reference_forward(edge_src, edge_dst, edge_type, rel_labels, heads, tails,
                      rel_vectors, params):
    (w1, b1, w2, b2, wr, br, wc1, wc2, bc, wf, bf) = params
    ieo = (edge_dst[None, :] == heads[:, None]).astype(jnp.float32)
    oeo = (edge_src[None, :] == heads[:, None]).astype(jnp.float32)
    iei = (edge_dst[None, :] == tails[:, None]).astype(jnp.float32)
    oei = (edge_src[None, :] == tails[:, None]).astype(jnp.float32)
    m5 = oeo * iei
    m6 = ieo * oei
    conns = [ieo - m6, oeo - m5, iei - m5, oei - m6, m5, m6]
    he = (rel_vectors[edge_type] @ w1 + b1) @ w2 + b2
    acc = 0.0
    for i in range(6):
        fe = he @ wr[i] + br[i]
        norm = jnp.sum(conns[i], axis=-1, keepdims=True) + 1e-30
        acc = acc + (conns[i] @ fe) / norm
    neigh = acc / 6.0
    hr = (rel_vectors[rel_labels] @ w1 + b1) @ w2 + b2
    z = jnp.maximum(neigh @ wc1 + hr @ wc2 + bc, 0.0)
    g_rep = z / jnp.maximum(jnp.sqrt(jnp.sum(z * z, -1, keepdims=True)), 1e-12)
    return g_rep @ wf + bf


# ------------------------------- main --------------------------------------- #
if __name__ == "__main__":
    key = jax.random.PRNGKey(0)

    # Small synthetic "batched graph" consistent with the module.
    B = 16           # subgraphs (one head + one tail each) -> 2 parallel B-tiles
    n_per = 6        # nodes per subgraph
    e_per = 24       # edges per subgraph
    E = B * e_per    # 384 edges -> 3 "arbitrary" E-tiles of 128
    num_rels = 16
    V = 32           # rel_vectors feature dim
    D = 32           # params.rel_emb_dim

    ks = jax.random.split(key, 16)

    src_local = jax.random.randint(ks[0], (B, e_per), 0, n_per)
    dst_local = jax.random.randint(ks[1], (B, e_per), 0, n_per)
    offs = (jnp.arange(B) * n_per)[:, None]
    edge_src = (src_local + offs).reshape(E).astype(jnp.int32)
    edge_dst = (dst_local + offs).reshape(E).astype(jnp.int32)
    edge_type = jax.random.randint(ks[2], (E,), 0, num_rels).astype(jnp.int32)
    rel_labels = jax.random.randint(ks[3], (B,), 0, num_rels).astype(jnp.int32)
    heads = (jnp.arange(B) * n_per).astype(jnp.int32)      # g.ndata['id'] == 1
    tails = (jnp.arange(B) * n_per + 1).astype(jnp.int32)  # g.ndata['id'] == 2

    rel_vectors = jax.random.normal(ks[4], (num_rels, V), jnp.float32)

    def lin(k, fan_in, fan_out):
        return jax.random.normal(k, (fan_in, fan_out), jnp.float32) / jnp.sqrt(fan_in)

    w1 = lin(ks[5], V, D);  b1 = jax.random.normal(ks[6], (1, D), jnp.float32) * 0.01
    w2 = lin(ks[7], D, D);  b2 = jax.random.normal(ks[8], (1, D), jnp.float32) * 0.01
    wr = jax.random.normal(ks[9], (6, D, D), jnp.float32) / jnp.sqrt(D)   # fc_reld
    br = jax.random.normal(ks[10], (6, 1, D), jnp.float32) * 0.01
    wc = lin(ks[11], 2 * D, D)                                            # conc
    wc1, wc2 = wc[:D], wc[D:]
    bc = jax.random.normal(ks[12], (1, D), jnp.float32) * 0.01
    wf = lin(ks[13], D, 1)                                                # fc_layer (ablation==3)
    bf = jax.random.normal(ks[14], (1, 1), jnp.float32) * 0.01
    params = (w1, b1, w2, b2, wr, br, wc1, wc2, bc, wf, bf)

    # TODO(synk): self.gnn / self.rel_emb / self.rel_depen are constructed in
    # __init__ but never used in forward(); they are intentionally omitted.

    out = graph_classifier_forward(edge_src, edge_dst, edge_type, rel_labels,
                                   heads, tails, rel_vectors, params)
    out = jax.block_until_ready(out)

    ref = reference_forward(edge_src, edge_dst, edge_type, rel_labels, heads,
                            tails, rel_vectors, params)
    assert out.shape == (B, 1)
    assert jnp.all(jnp.isfinite(out))
    assert jnp.allclose(out, ref, rtol=1e-3, atol=2e-3)
    print("KERNEL_OK")
</pallas_src>

<mosaic_0001>
module attributes {stable_mosaic.version = 11 : i64} {
  func.func @graph_classifier_kernel(%arg0: i32, %arg1: i32, %arg2: memref<8x1xi32, #tpu.memory_space<vmem>>, %arg3: memref<8x1xi32, #tpu.memory_space<vmem>>, %arg4: memref<1x128xi32, #tpu.memory_space<vmem>>, %arg5: memref<1x128xi32, #tpu.memory_space<vmem>>, %arg6: memref<1x128xi32, #tpu.memory_space<vmem>>, %arg7: memref<8x1xi32, #tpu.memory_space<vmem>>, %arg8: memref<24x128xf32, #tpu.memory_space<vmem>>, %arg9: memref<128x128xf32, #tpu.memory_space<vmem>>, %arg10: memref<1x128xf32, #tpu.memory_space<vmem>>, %arg11: memref<128x128xf32, #tpu.memory_space<vmem>>, %arg12: memref<1x128xf32, #tpu.memory_space<vmem>>, %arg13: memref<768x128xf32, #tpu.memory_space<vmem>>, %arg14: memref<6x128xf32, #tpu.memory_space<vmem>>, %arg15: memref<256x128xf32, #tpu.memory_space<vmem>>, %arg16: memref<1x128xf32, #tpu.memory_space<vmem>>, %arg17: memref<128x128xf32, #tpu.memory_space<vmem>>, %arg18: memref<1x128xf32, #tpu.memory_space<vmem>>, %arg19: memref<8x128xf32, #tpu.memory_space<vmem>>, %arg20: memref<48x24xf32, #tpu.memory_space<vmem>>) attributes {dimension_semantics = [#tpu.dimension_semantics<parallel>, #tpu.dimension_semantics<arbitrary>], iteration_bounds = array<i64: 2, 3>, scalar_prefetch = 0 : i64, scratch_operands = 1 : i64, tpu.core_type = #tpu.core_type<tc>, window_params = [{transform_indices = @transform_0, window_bounds = array<i64: 8, 1>}, {transform_indices = @transform_1, window_bounds = array<i64: 8, 1>}, {transform_indices = @transform_2, window_bounds = array<i64: 1, 128>}, {transform_indices = @transform_3, window_bounds = array<i64: 1, 128>}, {transform_indices = @transform_4, window_bounds = array<i64: 1, 128>}, {transform_indices = @transform_5, window_bounds = array<i64: 8, 1>}, {pipeline_mode = #tpu.pipeline_mode<synchronous>, transform_indices = @transform_6, window_bounds = array<i64: 24, 128>}, {pipeline_mode = #tpu.pipeline_mode<synchronous>, transform_indices = @transform_7, window_bounds = array<i64: 128, 128>}, {pipeline_mode = #tpu.pipeline_mode<synchronous>, transform_indices = @transform_8, window_bounds = array<i64: 1, 128>}, {pipeline_mode = #tpu.pipeline_mode<synchronous>, transform_indices = @transform_9, window_bounds = array<i64: 128, 128>}, {pipeline_mode = #tpu.pipeline_mode<synchronous>, transform_indices = @transform_10, window_bounds = array<i64: 1, 128>}, {pipeline_mode = #tpu.pipeline_mode<synchronous>, transform_indices = @transform_11, window_bounds = array<i64: 768, 128>}, {pipeline_mode = #tpu.pipeline_mode<synchronous>, transform_indices = @transform_12, window_bounds = array<i64: 6, 128>}, {pipeline_mode = #tpu.pipeline_mode<synchronous>, transform_indices = @transform_13, window_bounds = array<i64: 256, 128>}, {pipeline_mode = #tpu.pipeline_mode<synchronous>, transform_indices = @transform_14, window_bounds = array<i64: 1, 128>}, {pipeline_mode = #tpu.pipeline_mode<synchronous>, transform_indices = @transform_15, window_bounds = array<i64: 128, 128>}, {pipeline_mode = #tpu.pipeline_mode<synchronous>, transform_indices = @transform_16, window_bounds = array<i64: 1, 128>}, {transform_indices = @transform_17, window_bounds = array<i64: 8, 128>}]} {
    %c0 = arith.constant 0 : index
    %c0_0 = arith.constant 0 : index
    %0 = vector.load %arg2[%c0, %c0_0] : memref<8x1xi32, #tpu.memory_space<vmem>>, vector<8x1xi32>
    %c0_1 = arith.constant 0 : index
    %c0_2 = arith.constant 0 : index
    %1 = vector.load %arg3[%c0_1, %c0_2] : memref<8x1xi32, #tpu.memory_space<vmem>>, vector<8x1xi32>
    %c0_3 = arith.constant 0 : index
    %c0_4 = arith.constant 0 : index
    %2 = vector.load %arg4[%c0_3, %c0_4] : memref<1x128xi32, #tpu.memory_space<vmem>>, vector<1x128xi32>
    %c0_5 = arith.constant 0 : index
    %c0_6 = arith.constant 0 : index
    %3 = vector.load %arg5[%c0_5, %c0_6] : memref<1x128xi32, #tpu.memory_space<vmem>>, vector<1x128xi32>
    %4 = vector.broadcast %3 : vector<1x128xi32> to vector<8x128xi32>
    %5 = vector.broadcast %0 : vector<8x1xi32> to vector<8x128xi32>
    %6 = arith.cmpi eq, %4, %5 : vector<8x128xi32>
    %7 = arith.extui %6 : vector<8x128xi1> to vector<8x128xi32>
    %8 = arith.sitofp %7 : vector<8x128xi32> to vector<8x128xf32>
    %9 = vector.broadcast %2 : vector<1x128xi32> to vector<8x128xi32>
    %10 = vector.broadcast %0 : vector<8x1xi32> to vector<8x128xi32>
    %11 = arith.cmpi eq, %9, %10 : vector<8x128xi32>
    %12 = arith.extui %11 : vector<8x128xi1> to vector<8x128xi32>
    %13 = arith.sitofp %12 : vector<8x128xi32> to vector<8x128xf32>
    %14 = vector.broadcast %3 : vector<1x128xi32> to vector<8x128xi32>
    %15 = vector.broadcast %1 : vector<8x1xi32> to vector<8x128xi32>
    %16 = arith.cmpi eq, %14, %15 : vector<8x128xi32>
    %17 = arith.extui %16 : vector<8x128xi1> to vector<8x128xi32>
    %18 = arith.sitofp %17 : vector<8x128xi32> to vector<8x128xf32>
    %19 = vector.broadcast %2 : vector<1x128xi32> to vector<8x128xi32>
    %20 = vector.broadcast %1 : vector<8x1xi32> to vector<8x128xi32>
    %21 = arith.cmpi eq, %19, %20 : vector<8x128xi32>
    %22 = arith.extui %21 : vector<8x128xi1> to vector<8x128xi32>
    %23 = arith.sitofp %22 : vector<8x128xi32> to vector<8x128xf32>
    %24 = arith.mulf %13, %18 : vector<8x128xf32>
    %25 = arith.mulf %8, %23 : vector<8x128xf32>
    %26 = arith.subf %8, %25 : vector<8x128xf32>
    %27 = arith.subf %13, %24 : vector<8x128xf32>
    %28 = arith.subf %18, %24 : vector<8x128xf32>
    %29 = arith.subf %23, %25 : vector<8x128xf32>
    %30 = tpu.concatenate %26, %27, %28, %29, %24, %25 in 0 : vector<8x128xf32>, vector<8x128xf32>, vector<8x128xf32>, vector<8x128xf32>, vector<8x128xf32>, vector<8x128xf32> -> vector<48x128xf32>
    %31 = arith.truncf %30 : vector<48x128xf32> to vector<48x128xbf16>
    %c0_7 = arith.constant 0 : index
    %c0_8 = arith.constant 0 : index
    %32 = vector.load %arg6[%c0_7, %c0_8] : memref<1x128xi32, #tpu.memory_space<vmem>>, vector<1x128xi32>
    %33 = tpu.iota {dimensions = array<i32: 0>} : vector<24x128xi32>
    %34 = vector.broadcast %32 : vector<1x128xi32> to vector<24x128xi32>
    %35 = arith.cmpi eq, %33, %34 : vector<24x128xi32>
    %c16_i32 = arith.constant 16 : i32
    %36 = vector.broadcast %c16_i32 : i32 to vector<24x128xi32>
    %37 = arith.cmpi eq, %33, %36 : vector<24x128xi32>
    %38 = arith.ori %35, %37 : vector<24x128xi1>
    %cst = arith.constant 1.000000e+00 : f32
    %cst_9 = arith.constant 0.000000e+00 : f32
    %39 = vector.broadcast %cst : f32 to vector<24x128xf32>
    %40 = vector.broadcast %cst_9 : f32 to vector<24x128xf32>
    %41 = arith.select %38, %39, %40 : vector<24x128xi1>, vector<24x128xf32>
    %42 = arith.truncf %41 : vector<24x128xf32> to vector<24x128xbf16>
    %cst_10 = arith.constant dense<0.000000e+00> : vector<48x24xf32>
    %43 = tpu.matmul %31, %42, %cst_10 {dimension_numbers = #tpu.dot_dimension_numbers<[1], [1], [0], [0], [0, 0, 1, 0], [], []>} : vector<48x128xbf16>, vector<24x128xbf16>, vector<48x24xf32> -> vector<48x24xf32>
    %c0_i32 = arith.constant 0 : i32
    %44 = arith.cmpi eq, %arg1, %c0_i32 : i32
    %45 = arith.extui %44 : i1 to i32
    %c0_i32_11 = arith.constant 0 : i32
    %46 = arith.cmpi ne, %45, %c0_i32_11 : i32
    scf.if %46 {
      %cst_17 = arith.constant 0.000000e+00 : f32
      %53 = vector.broadcast %cst_17 : f32 to vector<48x24xf32>
      %c0_18 = arith.constant 0 : index
      %c0_19 = arith.constant 0 : index
      %54 = vector.load %arg20[%c0_18, %c0_19] : memref<48x24xf32, #tpu.memory_space<vmem>>, vector<48x24xf32>
      tpu.vector_store %arg20[%c0_18, %c0_19], %53 {strides = array<i32>} : memref<48x24xf32, #tpu.memory_space<vmem>>, vector<48x24xf32>,
    } else {
    }
    %c0_12 = arith.constant 0 : index
    %c0_13 = arith.constant 0 : index
    %47 = vector.load %arg20[%c0_12, %c0_13] : memref<48x24xf32, #tpu.memory_space<vmem>>, vector<48x24xf32>
    %48 = arith.addf %47, %43 : vector<48x24xf32>
    %c0_14 = arith.constant 0 : index
    %c0_15 = arith.constant 0 : index
    %49 = vector.load %arg20[%c0_14, %c0_15] : memref<48x24xf32, #tpu.memory_space<vmem>>, vector<48x24xf32>
    tpu.vector_store %arg20[%c0_14, %c0_15], %48 {strides = array<i32>} : memref<48x24xf32, #tpu.memory_space<vmem>>, vector<48x24xf32>,
    %c2_i32 = arith.constant 2 : i32
    %50 = arith.cmpi eq, %arg1, %c2_i32 : i32
    %51 = arith.extui %50 : i1 to i32
    %c0_i32_16 = arith.constant 0 : i32
    %52 = arith.cmpi ne, %51, %c0_i32_16 : i32
    scf.if %52 {
      %c0_17 = arith.constant 0 : index
      %c0_18 = arith.constant 0 : index
      %53 = vector.load %arg20[%c0_17, %c0_18] : memref<48x24xf32, #tpu.memory_space<vmem>>, vector<48x24xf32>
      %54 = vector.extract_strided_slice %53 {offsets = [0, 16], sizes = [48, 1], strides = [1, 1]} : vector<48x24xf32> to vector<48x1xf32>
      %cst_19 = arith.constant 1.000000e-30 : f32
      %55 = vector.broadcast %cst_19 : f32 to vector<48x1xf32>
      %56 = arith.addf %54, %55 : vector<48x1xf32>
      %57 = tpu.reciprocal %56 : vector<48x1xf32> -> vector<48x1xf32>
      %58 = arith.mulf %54, %57 : vector<48x1xf32>
      %c0_20 = arith.constant 0 : index
      %c0_21 = arith.constant 0 : index
      %59 = vector.load %arg8[%c0_20, %c0_21] : memref<24x128xf32, #tpu.memory_space<vmem>>, vector<24x128xf32>
      %c0_22 = arith.constant 0 : index
      %c0_23 = arith.constant 0 : index
      %60 = vector.load %arg9[%c0_22, %c0_23] : memref<128x128xf32, #tpu.memory_space<vmem>>, vector<128x128xf32>
      %cst_24 = arith.constant dense<0.000000e+00> : vector<24x128xf32>
      %61 = tpu.matmul %59, %60, %cst_24 {dimension_numbers = #tpu.dot_dimension_numbers<[1], [0], [0], [1], [0, 0, 1, 1], [], []>} : vector<24x128xf32>, vector<128x128xf32>, vector<24x128xf32> -> vector<24x128xf32>
      %c0_25 = arith.constant 0 : index
      %c0_26 = arith.constant 0 : index
      %62 = vector.load %arg10[%c0_25, %c0_26] : memref<1x128xf32, #tpu.memory_space<vmem>>, vector<1x128xf32>
      %63 = vector.broadcast %62 : vector<1x128xf32> to vector<24x128xf32>
      %64 = arith.addf %61, %63 : vector<24x128xf32>
      %c0_27 = arith.constant 0 : index
      %c0_28 = arith.constant 0 : index
      %65 = vector.load %arg11[%c0_27, %c0_28] : memref<128x128xf32, #tpu.memory_space<vmem>>, vector<128x128xf32>
      %cst_29 = arith.constant dense<0.000000e+00> : vector<24x128xf32>
      %66 = tpu.matmul %64, %65, %cst_29 {dimension_numbers = #tpu.dot_dimension_numbers<[1], [0], [0], [1], [0, 0, 1, 1], [], []>} : vector<24x128xf32>, vector<128x128xf32>, vector<24x128xf32> -> vector<24x128xf32>
      %c0_30 = arith.constant 0 : index
      %c0_31 = arith.constant 0 : index
      %67 = vector.load %arg12[%c0_30, %c0_31] : memref<1x128xf32, #tpu.memory_space<vmem>>, vector<1x128xf32>
      %68 = vector.broadcast %67 : vector<1x128xf32> to vector<24x128xf32>
      %69 = arith.addf %66, %68 : vector<24x128xf32>
      %70 = tpu.iota {dimensions = array<i32: 0>} : vector<24x1xi32>
      %c16_i32_32 = arith.constant 16 : i32
      %71 = vector.broadcast %c16_i32_32 : i32 to vector<24x1xi32>
      %72 = arith.cmpi slt, %70, %71 : vector<24x1xi32>
      %cst_33 = arith.constant 0.000000e+00 : f32
      %73 = vector.shape_cast %72 : vector<24x1xi1> to vector<24x1xi1>
      %74 = vector.broadcast %73 : vector<24x1xi1> to vector<24x128xi1>
      %75 = vector.broadcast %cst_33 : f32 to vector<24x128xf32>
      %76 = arith.select %74, %69, %75 : vector<24x128xi1>, vector<24x128xf32>
      %cst_34 = arith.constant dense<0.000000e+00> : vector<48x128xf32>
      %77 = tpu.matmul %53, %76, %cst_34 {dimension_numbers = #tpu.dot_dimension_numbers<[1], [0], [0], [1], [0, 0, 1, 1], [], []>} : vector<48x24xf32>, vector<24x128xf32>, vector<48x128xf32> -> vector<48x128xf32>
      %78 = vector.broadcast %57 : vector<48x1xf32> to vector<48x128xf32>
      %79 = arith.mulf %77, %78 : vector<48x128xf32>
      %80 = vector.extract_strided_slice %79 {offsets = [0, 0], sizes = [8, 128], strides = [1, 1]} : vector<48x128xf32> to vector<8x128xf32>
      %81 = vector.extract_strided_slice %79 {offsets = [8, 0], sizes = [8, 128], strides = [1, 1]} : vector<48x128xf32> to vector<8x128xf32>
      %82 = vector.extract_strided_slice %79 {offsets = [16, 0], sizes = [8, 128], strides = [1, 1]} : vector<48x128xf32> to vector<8x128xf32>
      %83 = vector.extract_strided_slice %79 {offsets = [24, 0], sizes = [8, 128], strides = [1, 1]} : vector<48x128xf32> to vector<8x128xf32>
      %84 = vector.extract_strided_slice %79 {offsets = [32, 0], sizes = [8, 128], strides = [1, 1]} : vector<48x128xf32> to vector<8x128xf32>
      %85 = vector.extract_strided_slice %79 {offsets = [40, 0], sizes = [8, 128], strides = [1, 1]} : vector<48x128xf32> to vector<8x128xf32>
      %86 = tpu.concatenate %80, %81, %82, %83, %84, %85 in 1 : vector<8x128xf32>, vector<8x128xf32>, vector<8x128xf32>, vector<8x128xf32>, vector<8x128xf32>, vector<8x128xf32> -> vector<8x768xf32>
      %c0_35 = arith.constant 0 : index
      %c0_36 = arith.constant 0 : index
      %87 = vector.load %arg13[%c0_35, %c0_36] : memref<768x128xf32, #tpu.memory_space<vmem>>, vector<768x128xf32>
      %cst_37 = arith.constant dense<0.000000e+00> : vector<8x128xf32>
      %88 = tpu.matmul %86, %87, %cst_37 {dimension_numbers = #tpu.dot_dimension_numbers<[1], [0], [0], [1], [0, 0, 1, 1], [], []>} : vector<8x768xf32>, vector<768x128xf32>, vector<8x128xf32> -> vector<8x128xf32>
      %c0_38 = arith.constant 0 : index
      %c0_39 = arith.constant 0 : index
      %89 = vector.load %arg14[%c0_38, %c0_39] : memref<6x128xf32, #tpu.memory_space<vmem>>, vector<6x128xf32>
      %90 = vector.extract_strided_slice %58 {offsets = [0, 0], sizes = [8, 1], strides = [1, 1]} : vector<48x1xf32> to vector<8x1xf32>
      %91 = vector.extract_strided_slice %89 {offsets = [0, 0], sizes = [1, 128], strides = [1, 1]} : vector<6x128xf32> to vector<1x128xf32>
      %92 = vector.broadcast %90 : vector<8x1xf32> to vector<8x128xf32>
      %93 = vector.broadcast %91 : vector<1x128xf32> to vector<8x128xf32>
      %94 = arith.mulf %92, %93 : vector<8x128xf32>
      %95 = arith.addf %88, %94 : vector<8x128xf32>
      %96 = vector.extract_strided_slice %58 {offsets = [8, 0], sizes = [8, 1], strides = [1, 1]} : vector<48x1xf32> to vector<8x1xf32>
      %97 = vector.extract_strided_slice %89 {offsets = [1, 0], sizes = [1, 128], strides = [1, 1]} : vector<6x128xf32> to vector<1x128xf32>
      %98 = vector.broadcast %96 : vector<8x1xf32> to vector<8x128xf32>
      %99 = vector.broadcast %97 : vector<1x128xf32> to vector<8x128xf32>
      %100 = arith.mulf %98, %99 : vector<8x128xf32>
      %101 = arith.addf %95, %100 : vector<8x128xf32>
      %102 = vector.extract_strided_slice %58 {offsets = [16, 0], sizes = [8, 1], strides = [1, 1]} : vector<48x1xf32> to vector<8x1xf32>
      %103 = vector.extract_strided_slice %89 {offsets = [2, 0], sizes = [1, 128], strides = [1, 1]} : vector<6x128xf32> to vector<1x128xf32>
      %104 = vector.broadcast %102 : vector<8x1xf32> to vector<8x128xf32>
      %105 = vector.broadcast %103 : vector<1x128xf32> to vector<8x128xf32>
      %106 = arith.mulf %104, %105 : vector<8x128xf32>
      %107 = arith.addf %101, %106 : vector<8x128xf32>
      %108 = vector.extract_strided_slice %58 {offsets = [24, 0], sizes = [8, 1], strides = [1, 1]} : vector<48x1xf32> to vector<8x1xf32>
      %109 = vector.extract_strided_slice %89 {offsets = [3, 0], sizes = [1, 128], strides = [1, 1]} : vector<6x128xf32> to vector<1x128xf32>
      %110 = vector.broadcast %108 : vector<8x1xf32> to vector<8x128xf32>
      %111 = vector.broadcast %109 : vector<1x128xf32> to vector<8x128xf32>
      %112 = arith.mulf %110, %111 : vector<8x128xf32>
      %113 = arith.addf %107, %112 : vector<8x128xf32>
      %114 = vector.extract_strided_slice %58 {offsets = [32, 0], sizes = [8, 1], strides = [1, 1]} : vector<48x1xf32> to vector<8x1xf32>
      %115 = vector.extract_strided_slice %89 {offsets = [4, 0], sizes = [1, 128], strides = [1, 1]} : vector<6x128xf32> to vector<1x128xf32>
      %116 = vector.broadcast %114 : vector<8x1xf32> to vector<8x128xf32>
      %117 = vector.broadcast %115 : vector<1x128xf32> to vector<8x128xf32>
      %118 = arith.mulf %116, %117 : vector<8x128xf32>
      %119 = arith.addf %113, %118 : vector<8x128xf32>
      %120 = vector.extract_strided_slice %58 {offsets = [40, 0], sizes = [8, 1], strides = [1, 1]} : vector<48x1xf32> to vector<8x1xf32>
      %121 = vector.extract_strided_slice %89 {offsets = [5, 0], sizes = [1, 128], strides = [1, 1]} : vector<6x128xf32> to vector<1x128xf32>
      %122 = vector.broadcast %120 : vector<8x1xf32> to vector<8x128xf32>
      %123 = vector.broadcast %121 : vector<1x128xf32> to vector<8x128xf32>
      %124 = arith.mulf %122, %123 : vector<8x128xf32>
      %125 = arith.addf %119, %124 : vector<8x128xf32>
      %cst_40 = arith.constant 0.166666672 : f32
      %126 = vector.broadcast %cst_40 : f32 to vector<8x128xf32>
      %127 = arith.mulf %125, %126 : vector<8x128xf32>
      %c0_41 = arith.constant 0 : index
      %c0_42 = arith.constant 0 : index
      %128 = vector.load %arg7[%c0_41, %c0_42] : memref<8x1xi32, #tpu.memory_space<vmem>>, vector<8x1xi32>
      %129 = tpu.iota {dimensions = array<i32: 1>} : vector<8x24xi32>
      %130 = vector.broadcast %128 : vector<8x1xi32> to vector<8x24xi32>
      %131 = arith.cmpi eq, %129, %130 : vector<8x24xi32>
      %132 = arith.extui %131 : vector<8x24xi1> to vector<8x24xi32>
      %133 = arith.sitofp %132 : vector<8x24xi32> to vector<8x24xf32>
      %cst_43 = arith.constant dense<0.000000e+00> : vector<8x128xf32>
      %134 = tpu.matmul %133, %76, %cst_43 {dimension_numbers = #tpu.dot_dimension_numbers<[1], [0], [0], [1], [0, 0, 1, 1], [], []>} : vector<8x24xf32>, vector<24x128xf32>, vector<8x128xf32> -> vector<8x128xf32>
      %135 = tpu.concatenate %127, %134 in 1 : vector<8x128xf32>, vector<8x128xf32> -> vector<8x256xf32>
      %c0_44 = arith.constant 0 : index
      %c0_45 = arith.constant 0 : index
      %136 = vector.load %arg15[%c0_44, %c0_45] : memref<256x128xf32, #tpu.memory_space<vmem>>, vector<256x128xf32>
      %cst_46 = arith.constant dense<0.000000e+00> : vector<8x128xf32>
      %137 = tpu.matmul %135, %136, %cst_46 {dimension_numbers = #tpu.dot_dimension_numbers<[1], [0], [0], [1], [0, 0, 1, 1], [], []>} : vector<8x256xf32>, vector<256x128xf32>, vector<8x128xf32> -> vector<8x128xf32>
      %c0_47 = arith.constant 0 : index
      %c0_48 = arith.constant 0 : index
      %138 = vector.load %arg16[%c0_47, %c0_48] : memref<1x128xf32, #tpu.memory_space<vmem>>, vector<1x128xf32>
      %139 = vector.broadcast %138 : vector<1x128xf32> to vector<8x128xf32>
      %140 = arith.addf %137, %139 : vector<8x128xf32>
      %cst_49 = arith.constant 0.000000e+00 : f32
      %141 = vector.broadcast %cst_49 : f32 to vector<8x128xf32>
      %142 = arith.maximumf %140, %141 : vector<8x128xf32>
      %143 = arith.mulf %142, %142 : vector<8x128xf32>
      %cst_50 = arith.constant dense<0.000000e+00> : vector<8xf32>
      %144 = vector.multi_reduction <add>, %143, %cst_50 [1] : vector<8x128xf32> to vector<8xf32>
      %145 = vector.shape_cast %144 : vector<8xf32> to vector<8x1xf32>
      %cst_51 = arith.constant 1.000000e-24 : f32
      %146 = vector.broadcast %cst_51 : f32 to vector<8x1xf32>
      %147 = arith.maximumf %145, %146 : vector<8x1xf32>
      %148 = math.rsqrt %147 : vector<8x1xf32>
      %149 = vector.broadcast %148 : vector<8x1xf32> to vector<8x128xf32>
      %150 = arith.mulf %142, %149 : vector<8x128xf32>
      %c0_52 = arith.constant 0 : index
      %c0_53 = arith.constant 0 : index
      %151 = vector.load %arg17[%c0_52, %c0_53] : memref<128x128xf32, #tpu.memory_space<vmem>>, vector<128x128xf32>
      %cst_54 = arith.constant dense<0.000000e+00> : vector<8x128xf32>
      %152 = tpu.matmul %150, %151, %cst_54 {dimension_numbers = #tpu.dot_dimension_numbers<[1], [0], [0], [1], [0, 0, 1, 1], [], []>} : vector<8x128xf32>, vector<128x128xf32>, vector<8x128xf32> -> vector<8x128xf32>
      %c0_55 = arith.constant 0 : index
      %c0_56 = arith.constant 0 : index
      %153 = vector.load %arg18[%c0_55, %c0_56] : memref<1x128xf32, #tpu.memory_space<vmem>>, vector<1x128xf32>
      %154 = vector.broadcast %153 : vector<1x128xf32> to vector<8x128xf32>
      %155 = arith.addf %152, %154 : vector<8x128xf32>
      %c0_57 = arith.constant 0 : index
      %c0_58 = arith.constant 0 : index
      %156 = vector.load %arg19[%c0_57, %c0_58] : memref<8x128xf32, #tpu.memory_space<vmem>>, vector<8x128xf32>
      tpu.vector_store %arg19[%c0_57, %c0_58], %155 {strides = array<i32>} : memref<8x128xf32, #tpu.memory_space<vmem>>, vector<8x128xf32>,
    } else {
    }
    return
  }
  func.func @transform_0(%arg0: i32, %arg1: i32) -> (i32, i32) {
    %c0_i32 = arith.constant 0 : i32
    %c0_i32_0 = arith.constant 0 : i32
    return %arg0, %c0_i32 : i32, i32
  }
  func.func @transform_1(%arg0: i32, %arg1: i32) -> (i32, i32) {
    %c0_i32 = arith.constant 0 : i32
    %c0_i32_0 = arith.constant 0 : i32
    return %arg0, %c0_i32 : i32, i32
  }
  func.func @transform_2(%arg0: i32, %arg1: i32) -> (i32, i32) {
    %c0_i32 = arith.constant 0 : i32
    %c0_i32_0 = arith.constant 0 : i32
    return %c0_i32, %arg1 : i32, i32
  }
  func.func @transform_3(%arg0: i32, %arg1: i32) -> (i32, i32) {
    %c0_i32 = arith.constant 0 : i32
    %c0_i32_0 = arith.constant 0 : i32
    return %c0_i32, %arg1 : i32, i32
  }
  func.func @transform_4(%arg0: i32, %arg1: i32) -> (i32, i32) {
    %c0_i32 = arith.constant 0 : i32
    %c0_i32_0 = arith.constant 0 : i32
    return %c0_i32, %arg1 : i32, i32
  }
  func.func @transform_5(%arg0: i32, %arg1: i32) -> (i32, i32) {
    %c0_i32 = arith.constant 0 : i32
    %c0_i32_0 = arith.constant 0 : i32
    return %arg0, %c0_i32 : i32, i32
  }
  func.func @transform_6(%arg0: i32, %arg1: i32) -> (i32, i32) {
    %c0_i32 = arith.constant 0 : i32
    %c0_i32_0 = arith.constant 0 : i32
    %c0_i32_1 = arith.constant 0 : i32
    return %c0_i32, %c0_i32_0 : i32, i32
  }
  func.func @transform_7(%arg0: i32, %arg1: i32) -> (i32, i32) {
    %c0_i32 = arith.constant 0 : i32
    %c0_i32_0 = arith.constant 0 : i32
    %c0_i32_1 = arith.constant 0 : i32
    return %c0_i32, %c0_i32_0 : i32, i32
  }
  func.func @transform_8(%arg0: i32, %arg1: i32) -> (i32, i32) {
    %c0_i32 = arith.constant 0 : i32
    %c0_i32_0 = arith.constant 0 : i32
    %c0_i32_1 = arith.constant 0 : i32
    return %c0_i32, %c0_i32_0 : i32, i32
  }
  func.func @transform_9(%arg0: i32, %arg1: i32) -> (i32, i32) {
    %c0_i32 = arith.constant 0 : i32
    %c0_i32_0 = arith.constant 0 : i32
    %c0_i32_1 = arith.constant 0 : i32
    return %c0_i32, %c0_i32_0 : i32, i32
  }
  func.func @transform_10(%arg0: i32, %arg1: i32) -> (i32, i32) {
    %c0_i32 = arith.constant 0 : i32
    %c0_i32_0 = arith.constant 0 : i32
    %c0_i32_1 = arith.constant 0 : i32
    return %c0_i32, %c0_i32_0 : i32, i32
  }
  func.func @transform_11(%arg0: i32, %arg1: i32) -> (i32, i32) {
    %c0_i32 = arith.constant 0 : i32
    %c0_i32_0 = arith.constant 0 : i32
    %c0_i32_1 = arith.constant 0 : i32
    return %c0_i32, %c0_i32_0 : i32, i32
  }
  func.func @transform_12(%arg0: i32, %arg1: i32) -> (i32, i32) {
    %c0_i32 = arith.constant 0 : i32
    %c0_i32_0 = arith.constant 0 : i32
    %c0_i32_1 = arith.constant 0 : i32
    return %c0_i32, %c0_i32_0 : i32, i32
  }
  func.func @transform_13(%arg0: i32, %arg1: i32) -> (i32, i32) {
    %c0_i32 = arith.constant 0 : i32
    %c0_i32_0 = arith.constant 0 : i32
    %c0_i32_1 = arith.constant 0 : i32
    return %c0_i32, %c0_i32_0 : i32, i32
  }
  func.func @transform_14(%arg0: i32, %arg1: i32) -> (i32, i32) {
    %c0_i32 = arith.constant 0 : i32
    %c0_i32_0 = arith.constant 0 : i32
    %c0_i32_1 = arith.constant 0 : i32
    return %c0_i32, %c0_i32_0 : i32, i32
  }
  func.func @transform_15(%arg0: i32, %arg1: i32) -> (i32, i32) {
    %c0_i32 = arith.constant 0 : i32
    %c0_i32_0 = arith.constant 0 : i32
    %c0_i32_1 = arith.constant 0 : i32
    return %c0_i32, %c0_i32_0 : i32, i32
  }
  func.func @transform_16(%arg0: i32, %arg1: i32) -> (i32, i32) {
    %c0_i32 = arith.constant 0 : i32
    %c0_i32_0 = arith.constant 0 : i32
    %c0_i32_1 = arith.constant 0 : i32
    return %c0_i32, %c0_i32_0 : i32, i32
  }
  func.func @transform_17(%arg0: i32, %arg1: i32) -> (i32, i32) {
    %c0_i32 = arith.constant 0 : i32
    %c0_i32_0 = arith.constant 0 : i32
    return %arg0, %c0_i32 : i32, i32
  }
}

</mosaic_0001>

<bundles_post_ra>
// kernel: tpu_custom_call.1
= control target key start
LH: loop header
LB: loop body
LE: loop exit
PB: predicated region body
PF: predicated region fallthrough
CT: control target
= control target key end

     0   :  { %s3696_s0 = inlined_call_operand.vmem [shape: s32[16,1], index: 0, kind: input, shape index: {}]   ;;  %s3697_s1 = inlined_call_operand.vmem [shape: s32[16,1], index: 1, kind: input, shape index: {}]   ;;  %s3698_s2 = inlined_call_operand.vmem [shape: s32[1,384], index: 2, kind: input, shape index: {}]   ;;  %s3699_s3 = inlined_call_operand.vmem [shape: s32[1,384], index: 3, kind: input, shape index: {}]   ;;  %s3700_s4 = inlined_call_operand.vmem [shape: s32[1,384], index: 4, kind: input, shape index: {}]   ;;  %s3701_s5 = inlined_call_operand.vmem [shape: s32[16,1], index: 5, kind: input, shape index: {}]   ;;  %s3702_s6 = inlined_call_operand.vmem [shape: f32[24,128], index: 6, kind: input, shape index: {}]   ;;  %s3703_s7 = inlined_call_operand.hbm [shape: f32[128,128], index: 7, kind: input, shape index: {}]   ;;  %s3704_s8 = inlined_call_operand.vmem [shape: f32[1,128], index: 8, kind: input, shape index: {}]   ;;  %s3705_s9 = inlined_call_operand.hbm [shape: f32[128,128], index: 9, kind: input, shape index: {}]   ;;  %s3706_s10 = inlined_call_operand.vmem [shape: f32[1,128], index: 10, kind: input, shape index: {}]   ;;  %s3707_s11 = inlined_call_operand.hbm [shape: f32[768,128], index: 11, kind: input, shape index: {}]   ;;  %s3708_s12 = inlined_call_operand.vmem [shape: f32[6,128], index: 12, kind: input, shape index: {}]   ;;  %s3709_s13 = inlined_call_operand.hbm [shape: f32[256,128], index: 13, kind: input, shape index: {}]   ;;  %s3710_s14 = inlined_call_operand.vmem [shape: f32[1,128], index: 14, kind: input, shape index: {}]   ;;  %s3711_s15 = inlined_call_operand.hbm [shape: f32[128,128], index: 15, kind: input, shape index: {}]   ;;  %s3712_s16 = inlined_call_operand.vmem [shape: f32[1,128], index: 16, kind: input, shape index: {}]   ;;  %s3713_s17 = inlined_call_operand.hbm [shape: f32[16,128], index: 17, kind: output, shape index: {}]  }
   0x1   :  { %3729 = sst [smem:[#allocation27_spill]] %s3696_s0 }
   0x2   :  { %3730 = sst [smem:[#allocation28_spill]] %s3697_s1 }
   0x3   :  { %3731 = sst [smem:[#allocation29_spill]] %s3704_s8 }
   0x4   :  { %3732 = sst [smem:[#allocation30_spill]] %s3705_s9 }
   0x5   :  { %3733 = sst [smem:[#allocation31_spill]] %s3706_s10 }
   0x6   :  { %3734 = sst [smem:[#allocation32_spill]] %s3708_s12 }
   0x7   :  { %3735 = sst [smem:[#allocation33_spill]] %s3710_s14 }
   0x8   :  { %3736 = sst [smem:[#allocation34_spill]] %s3712_s16 }
   0x9   :  { %3737 = sst [smem:[#allocation35_spill]] %s3713_s17 }
   0xa   :  { %22 = vsyncpa [#allocation4], 0 }
   0xb   :  { %23 = vsyncpa [#allocation7], 0 }
   0xc   :  { %24 = vsyncpa [#allocation10], 0 }
   0xd   :  { %25 = vsyncpa [#allocation5], 0 }
   0xe   :  { %27 = vsyncpa [#allocation5 + $0x1], 0  ;;  %s3236_s24 = smov 0   ;;  %s3238_s25 = smov 0  }
   0xf   :  { %s3240_s26 = smov 0   ;;  %s3242_s27 = smov 0  }
  0x10   :  { %s3244_s28 = smov 0   ;;  %s3246_s29 = smov 0  }
  0x11   :  { %s3248_s0 = smov 0   ;;  %s3250_s30 = smov 0  }
  0x12 LB: > { %3738 = sst [smem:[#allocation17_spill]] %s3098_s24  ;;  %s2103_s18 = sadd.s32 4294967295, %s3126_s30   ;;  %s3126_s30 = sphi %s3250_s30, %s33_s30   ;;  %s3122_s0 = sphi %s3248_s0, %s3776_s0   ;;  %s3118_s29 = sphi %s3246_s29, %s3775_s29   ;;  %s3114_s28 = sphi %s3244_s28, %s3774_s28   ;;  %s3110_s27 = sphi %s3242_s27, %s3773_s27   ;;  %s3106_s26 = sphi %s3240_s26, %s3772_s26   ;;  %s3102_s25 = sphi %s3238_s25, %s3778_s25   ;;  %s3098_s24 = sphi %s3236_s24, %s3777_s24  }
  0x13   : > { %3739 = sst [smem:[#allocation18_spill]] %s3106_s26  ;;  %s2104_s19 = sadd.s32 4294967294, %s3126_s30  }
  0x14   : > { %3740 = sst [smem:[#allocation19_spill]] %s3118_s29  ;;  %s42_s1 = sadd.s32 1, %s3118_s29 }
  0x15   : > { %3741 = sst [smem:[#allocation20_spill]] %s3122_s0  ;;  %s45_s20 = sadd.s32 1, %s3122_s0 }
  0x16   : > { %3742 = sst [smem:[#allocation21_spill]] %s3126_s30  ;;  %p43_p0 = scmp.ge.s32.totalorder %s42_s1, 3 }
  0x17   : > { %s439_s21 = sadd.s32 1, %s3106_s26  ;;  %p449_p1 = scmp.ne.s32.totalorder %s3106_s26, %s3102_s25 }
  0x18   : > { %p450_p2 = scmp.eq.s32.totalorder %s2103_s18, 5  ;;  %s3780_s1 = smov (%p43_p0, %s42_s1), 0 }
  0x19   : > { %3743 = sst [smem:[#allocation22_spill]] %s3780_s1  ;;  %s3782_s20 = smov (!%p43_p0, %s45_s20), %s3122_s0 }
  0x1a   : > { %p3286_p3 = por %p450_p2, %p449_p1  ;;  %p455_p4 = scmp.ne.s32.totalorder %s3102_s25, %s3098_s24 }
  0x1b   : > { %p47_p5 = scmp.ge.s32.totalorder %s3782_s20, 2  ;;  %p456_p6 = scmp.eq.s32.totalorder %s2104_s19, 5 }
  0x1c   : > { %s3744_s22 = scalar_select %p3286_p3, 1, 0 }
  0x1d   : > { %p2105_p7 = scmp.ge.s32.totalorder %s3126_s30, 1  ;;  %p463_p8 = scmp.lt.s32.totalorder %s3126_s30, 7 }
  0x1e   : > { %3745 = sst [smem:[#allocation23_spill]] %s3744_s22  ;;  %s3784_s20 = smov (%p47_p5, %s3782_s20), 0 }
  0x1f   : > { %3746 = sst [smem:[#allocation24_spill]] %s3784_s20  ;;  %p3296_p9 = por %p456_p6, %p455_p4 }
  0x20   : > { %p3300_p10 = pnand %p2105_p7, %p463_p8  ;;  %s436_s1 = ssub.s32 %s3122_s0, %s3784_s20 }
  0x21   : > { %s3747_s23 = scalar_select %p3296_p9, 1, 0 }
  0x22   : > { %s3749_s29 = scalar_select %p3300_p10, 1, 0 }
  0x23   : > { %3748 = sst [smem:[#allocation25_spill]] %s3747_s23  ;;  %p437_p11 = scmp.eq.s32.totalorder %s436_s1, 0 }
  0x24   : > { %p2748_p12 = pneg %p3300_p10  ;;  %p3308_p13 = scmp.eq.s32.totalorder %s2103_s18, 0 }
  0x25   : > { %s3313_s24 = scalar_select %p437_p11, %s3106_s26, %s439_s21  }
  0x26   : > { %s3750_s19 = scalar_select %p3308_p13, 1, 0 }
  0x27   : > { %3751 = sst [smem:[#allocation26_spill]] %s3313_s24  ;;  %p3317_p0 = pnand %p3308_p13, %p2748_p12 }
  0x28   : > { %s3128_s23 = smov [#allocation6]   ;;  %s3129_s20 = smov [#allocation9]  }
  0x29   : > { %s494_s17 = sshll.u32 %s3128_s23, 4  ;;  %s526_s1 = sshll.u32 %s3129_s20, 4  ;;  %s495_s17 = int_to_ptr.vmem [resolvable:$true] %s494_s17  ;;  %s527_s1 = int_to_ptr.vmem [resolvable:$true] %s526_s1 }
  0x2a   : > { %s3753_s9 = sld [smem:[#allocation30_spill]]  ;;  %p3329_p2 = pneg %p3317_p0 }
  0x30   : > { %s2880_s18 = scalar_lea.hbm %s3753_s9, 2048 }
  0x31   : > { %p2881_p1 = scmp.ne.s32.totalorder %s3753_s9, %s2880_s18  ;;  %p2887_p6 = scmp.lt.u32.totalorder %s2880_s18, %s3753_s9 }
  0x33   : > { %p2883_p4 = pnand %p3329_p2, %p2881_p1 }
  0x35   : > { %p2884_p5 = pneg %p2883_p4 }
  0x37   : > { %p2889_p7 = pnand %p2887_p6, %p2884_p5 }
  0x39   : > { %2892 = shalt.err (!%p2889_p7)
}
  0x3a   : > { %s2893_s0 = scalar_lea.vmem %s495_s17, 2048  ;;  %p2901_p9 = scmp.lt.s32.totalorder %s495_s17, %s495_s17 }
  0x3b   : > { %p2894_p8 = scmp.ne.s32.totalorder %s495_s17, %s2893_s0  ;;  %p2902_p3 = scmp.lt.s32.totalorder %s2893_s0, %s2893_s0 }
  0x3d   : > { %p2896_p11 = pnand %p2894_p8, %p3329_p2  ;;  %p2903_p13 = por %p2902_p3, %p2901_p9 }
  0x3f   : > { %p2897_p12 = pneg %p2896_p11 }
  0x41   : > { %p2904_p10 = pnand %p2903_p13, %p2897_p12 }
  0x43   : > { %2907 = shalt.err (!%p2904_p10)
}
  0x44   : > { %s3130_s14 = smov 128   ;;  %s3131_s16 = smov 8  }
  0x45   : > { %2754 = dma.hbm_to_vmem [thread:$0]  (!%p3317_p0), %s3753_s9, 2048, %s495_s17, [#allocation7], %s3130_s14, %s3130_s14, %s3131_s16  }
  0x46   : > { %s2908_s23 = scalar_lea.hbm %s3709_s13, 4096 }
  0x47   : > { %p2909_p3 = scmp.ne.s32.totalorder %s3709_s13, %s2908_s23  ;;  %p2915_p13 = scmp.lt.u32.totalorder %s2908_s23, %s3709_s13 }
  0x49   : > { %p2911_p9 = pnand %p2909_p3, %p3329_p2 }
  0x4b   : > { %p2912_p10 = pneg %p2911_p9 }
  0x4d   : > { %p2917_p1 = pnand %p2915_p13, %p2912_p10 }
  0x4f   : > { %2920 = shalt.err (!%p2917_p1)
}
  0x50   : > { %s2921_s24 = scalar_lea.vmem %s527_s1, 4096  ;;  %p2929_p7 = scmp.lt.s32.totalorder %s527_s1, %s527_s1 }
  0x51   : > { %p2922_p4 = scmp.ne.s32.totalorder %s527_s1, %s2921_s24  ;;  %p2930_p8 = scmp.lt.s32.totalorder %s2921_s24, %s2921_s24 }
  0x53   : > { %p2924_p5 = pnand %p2922_p4, %p3329_p2  ;;  %p2931_p11 = por %p2930_p8, %p2929_p7 }
  0x55   : > { %p2925_p6 = pneg %p2924_p5 }
  0x57   : > { %p2932_p12 = pnand %p2931_p11, %p2925_p6 }
  0x59   : > { %2935 = shalt.err (!%p2932_p12)
}
  0x5a   : > { %2760 = dma.hbm_to_vmem [thread:$0]  (!%p3317_p0), %s3709_s13, 4096, %s527_s1, [#allocation10], %s3130_s14, %s3130_s14, %s3131_s16  }
  0x5b   : > { %s3132_s17 = smov [#allocation3]   ;;  %s3133_s20 = smov [#allocation8]  }
  0x5c   : > { %s478_s26 = sshll.u32 %s3132_s17, 4  ;;  %s510_s22 = sshll.u32 %s3133_s20, 4  ;;  %s479_s26 = int_to_ptr.vmem [resolvable:$true] %s478_s26  ;;  %s511_s22 = int_to_ptr.vmem [resolvable:$true] %s510_s22 }
  0x5d   : > { %s2936_s0 = scalar_lea.hbm %s3703_s7, 2048 }
  0x5e   : > { %p2937_p3 = scmp.ne.s32.totalorder %s3703_s7, %s2936_s0  ;;  %p2943_p13 = scmp.lt.u32.totalorder %s2936_s0, %s3703_s7 }
  0x60   : > { %p2939_p9 = pnand %p2937_p3, %p3329_p2 }
  0x62   : > { %p2940_p10 = pneg %p2939_p9 }
  0x64   : > { %p2945_p1 = pnand %p2943_p13, %p2940_p10 }
  0x66   : > { %2948 = shalt.err (!%p2945_p1)
}
  0x67   : > { %s2949_s1 = scalar_lea.vmem %s479_s26, 2048  ;;  %p2957_p7 = scmp.lt.s32.totalorder %s479_s26, %s479_s26 }
  0x68   : > { %p2950_p4 = scmp.ne.s32.totalorder %s479_s26, %s2949_s1  ;;  %p2958_p8 = scmp.lt.s32.totalorder %s2949_s1, %s2949_s1 }
  0x6a   : > { %p2952_p5 = pnand %p2950_p4, %p3329_p2  ;;  %p2959_p11 = por %p2958_p8, %p2957_p7 }
  0x6c   : > { %p2953_p6 = pneg %p2952_p5 }
  0x6e   : > { %p2960_p12 = pnand %p2959_p11, %p2953_p6 }
  0x70   : > { %2963 = shalt.err (!%p2960_p12)
}
  0x71   : > { %2751 = dma.hbm_to_vmem [thread:$0]  (!%p3317_p0), %s3703_s7, 2048, %s479_s26, [#allocation4], %s3130_s14, %s3130_s14, %s3131_s16  }
  0x72   : > { %s2964_s20 = scalar_lea.hbm %s3707_s11, 12288 }
  0x73   : > { %p2965_p3 = scmp.ne.s32.totalorder %s3707_s11, %s2964_s20  ;;  %p2971_p13 = scmp.lt.u32.totalorder %s2964_s20, %s3707_s11 }
  0x75   : > { %p2967_p9 = pnand %p2965_p3, %p3329_p2 }
  0x77   : > { %p2968_p10 = pneg %p2967_p9 }
  0x79   : > { %p2973_p1 = pnand %p2971_p13, %p2968_p10 }
  0x7b   : > { %2976 = shalt.err (!%p2973_p1)
}
  0x7c   : > { %s2977_s10 = scalar_lea.vmem %s511_s22, 12288  ;;  %p2985_p7 = scmp.lt.s32.totalorder %s511_s22, %s511_s22 }
  0x7d   : > { %p2978_p4 = scmp.ne.s32.totalorder %s511_s22, %s2977_s10  ;;  %p2986_p8 = scmp.lt.s32.totalorder %s2977_s10, %s2977_s10 }
  0x7f   : > { %p2980_p5 = pnand %p2978_p4, %p3329_p2  ;;  %p2987_p11 = por %p2986_p8, %p2985_p7 }
  0x81   : > { %p2981_p6 = pneg %p2980_p5 }
  0x83   : > { %p2988_p12 = pnand %p2987_p11, %p2981_p6 }
  0x85   : > { %2991 = shalt.err (!%p2988_p12)
}
  0x86   : > { %2757 = dma.hbm_to_vmem [thread:$0]  (!%p3317_p0), %s3707_s11, 12288, %s511_s22, [#allocation7], %s3130_s14, %s3130_s14, %s3131_s16  }
  0x87   : > { %s3134_s8 = smov [#allocation11]   ;;  %s2992_s20 = scalar_lea.hbm %s3711_s15, 2048 }
  0x88   : > { %s542_s9 = sshll.u32 %s3134_s8, 4  ;;  %p2993_p3 = scmp.ne.s32.totalorder %s3711_s15, %s2992_s20  ;;  %s543_s9 = int_to_ptr.vmem [resolvable:$true] %s542_s9 }
  0x89   : > { %p2999_p13 = scmp.lt.u32.totalorder %s2992_s20, %s3711_s15 }
  0x8a   : > { %p2995_p9 = pnand %p2993_p3, %p3329_p2 }
  0x8c   : > { %p2996_p10 = pneg %p2995_p9 }
  0x8e   : > { %p3001_p1 = pnand %p2999_p13, %p2996_p10 }
  0x90   : > { %3004 = shalt.err (!%p3001_p1)
}
  0x91   : > { %s3005_s22 = scalar_lea.vmem %s543_s9, 2048  ;;  %p3013_p7 = scmp.lt.s32.totalorder %s543_s9, %s543_s9 }
  0x92   : > { %p3006_p4 = scmp.ne.s32.totalorder %s543_s9, %s3005_s22  ;;  %p3014_p8 = scmp.lt.s32.totalorder %s3005_s22, %s3005_s22 }
  0x94   : > { %p3008_p5 = pnand %p3006_p4, %p3329_p2  ;;  %p3015_p11 = por %p3014_p8, %p3013_p7 }
  0x96   : > { %p3009_p6 = pneg %p3008_p5 }
  0x98   : > { %p3016_p12 = pnand %p3015_p11, %p3009_p6 }
  0x9a   : > { %3019 = shalt.err (!%p3016_p12)
}
  0x9b   : > { %2763 = dma.hbm_to_vmem [thread:$0]  (!%p3317_p0), %s3711_s15, 2048, %s543_s9, [#allocation10], %s3130_s14, %s3130_s14, %s3131_s16  }
  0x9c   : > { %p3755_p3 = scmp.ne.s32.totalorder %s3749_s29, 0 }
  0x9d   : > { %p3756_p2 = scmp.ne.s32.totalorder (!%p3755_p3), %s3750_s19, 0 }
  0x9e   : > { %600 = sbr.rel (%p3755_p3) target bundleno = 2114 (0x842), region = 88 }
  0xa5   : > { %3081 = dma.done.wait (%p3756_p2), [#allocation4], 2048  }
  0xa6   : > { %3083 = vsyncadd (%p3756_p2), [#allocation4], 4294965248 }
  0xa7   : > { %3085 = dma.done.wait (%p3756_p2), [#allocation7], 14336  }
  0xa8   : > { %3087 = vsyncadd (%p3756_p2), [#allocation7], 4294952960 }
  0xa9   : > { %3089 = dma.done.wait (%p3756_p2), [#allocation10], 6144  }
  0xaa   : > { %3091 = vsyncadd (%p3756_p2), [#allocation10], 4294961152  ;;  %p684_p0 = scmp.lt.s32.totalorder %s3114_s28, 1  ;;  %s681_s29 = sand.u32 1, %s3102_s25   ;;  %v746_v0 = vlaneseq  ;;  %v3135_v1 = vmov 0   ;;  %v3136_v2 = vmov 0.0  }
  0xab   : > { %2860 = vset.pattern.permute.xlu0 %v3135_v1  ;;  %s3450_s30 = sshll.u32 %s681_s29, 3  ;;  %2362 = vmatprep.subr.bf16.mxu0 %v3136_v2  ;;  %p692_p9 = scmp.lt.s32.totalorder %s3110_s27, 2  ;;  %v3137_v9 = vmov 1.0|1.0   ;;  %vm3138_vm6 = vmmov 0  }
  0xac   : > { %s685_s21 = scalar_select %p684_p0, %s3114_s28, 1  ;;  %2722 = vmatprep.subr.bf16.mxu1 %v3136_v2  ;;  %v3455_v3 = vshrl.u32 %v746_v0, 7  ;;  %2366 = vmatprep.mubr.msk.bf16.mxu0 %vm3138_vm6, %v3136_v2 }
  0xad   : > { %s3757_s1 = sld [smem:[#allocation27_spill]]  ;;  %s3758_s23 = sld [smem:[#allocation28_spill]]  ;;  %2370 = vmatprep.mubr.msk.bf16.mxu1 %vm3138_vm6, %v3136_v2 }
  0xae   : > { %s3457_s19 = sshll.u32 %s685_s21, 3  ;;  %v748_v5 = vadd.s32 8, %v3455_v3  ;;  %v749_v6 = vadd.s32 16, %v3455_v3  ;;  %s683_s12 = scalar_lea.vmem [#allocation12], %s3450_s30 }
  0xaf   : > { %s704_s17 = scalar_lea.vmem %s3701_s5, %s3457_s19  ;;  %p2133_p10 = scmp.ne.s32.totalorder %s3110_s27, 0 }
  0xb0   : > { %s3472_s24 = scalar_select %p692_p9, %s3110_s27, 2  ;;  %vm759_vm4 = vcmp.eq.s32.totalorder %v749_v6, 16 }
  0xb1   : > { %vm829_vm12 = vcmask (!%p2133_p10), 195584   ;;  %v3139_v39 = vmov (!%p2133_p10), 0.0  }
  0xb2   : > { %s700_s26 = scalar_lea.vmem %s3700_s4, %s3472_s24  ;;  %s694_s16 = scalar_lea.vmem %s3698_s2, %s3472_s24  ;;  %830 = vst.msk [vmem:[#allocation2] sm:$0xff] (!%p2133_p10), %vm829_vm12, %v3139_v39  ;;  %831 = vst.msk [vmem:[#allocation2 + $0x8] sm:$0xff] (!%p2133_p10), %vm829_vm12, %v3139_v39 }
  0xb3   : > { %s687_s8 = scalar_lea.vmem %s3757_s1, %s3457_s19  ;;  %s691_s0 = scalar_lea.vmem %s3758_s23, %s3457_s19  ;;  %v2128_v8 = vld [vmem:[%s700_s26] ss:$0 sm:$0xff]  ;;  %832 = vst.msk [vmem:[#allocation2 + $0x10] sm:$0xff] (!%p2133_p10), %vm829_vm12, %v3139_v39  ;;  %833 = vst.msk [vmem:[#allocation2 + $0x18] sm:$0xff] (!%p2133_p10), %vm829_vm12, %v3139_v39 }
  0xb4   : > { %v706_v4 = vld [vmem:[%s687_s8] sm:$0xff]  ;;  %vm754_vm0 = vcmp.eq.s32.totalorder %v3455_v3, %v2128_v8  ;;  %vm755_vm1 = vcmp.eq.s32.totalorder %v748_v5, %v2128_v8  ;;  %vm756_vm3 = vcmp.eq.s32.totalorder %v749_v6, %v2128_v8  ;;  %s697_s9 = scalar_lea.vmem %s3699_s3, %s3472_s24  ;;  %834 = vst.msk [vmem:[#allocation2 + $0x20] sm:$0xff] (!%p2133_p10), %vm829_vm12, %v3139_v39  ;;  %835 = vst.msk [vmem:[#allocation2 + $0x28] sm:$0xff] (!%p2133_p10), %vm829_vm12, %v3139_v39 }
  0xb5   : > { %715 = vperm.xlu0 %2860, %v706_v4   ;;  %v707_v7 = vld [vmem:[%s691_s0] sm:$0xff]  ;;  %vm2129_vm2 = vmpackc.low %vm755_vm1, %vm754_vm0 }
  0xb6   : > { %2363 = vmatpush3.bf16.xpose.msk.msra.mxu0 %vm2129_vm2, %v3137_v9  ;;  %2724 = vmatpush3.bf16.xpose.msk.msra.mxu1 %vm2129_vm2, %v3137_v9  ;;  %vm762_vm5 = vmor %vm756_vm3, %vm759_vm4  ;;  %v2124_v11 = vld [vmem:[%s694_s16] ss:$0 sm:$0xff] }
  0xb7   : > { %2364 = vmatprep.subr.bf16.mxu0 %v3136_v2  ;;  %2723 = vmatprep.subr.bf16.mxu1 %v3136_v2  ;;  %vm2131_vm7 = vmpackc.low %vm762_vm5, %vm762_vm5  ;;  %v2122_v12 = vld [vmem:[%s697_s9] ss:$0 sm:$0xff] }
  0xb9   : > { %728 = vperm.xlu0 %2860, %v707_v7  }
  0xbe   : > { %2365 = vmatpush3.bf16.xpose.msk.msra.mxu0 %vm2131_vm7, %v3137_v9  ;;  %2725 = vmatpush3.bf16.xpose.msk.msra.mxu1 %vm2131_vm7, %v3137_v9 }
 0x134   : > { %v716_v10 = vpop.permute.xlu0 %715 }
 0x135   : > { %vm717_vm8 = vcmp.eq.s32.totalorder %v2122_v12, %v716_v10  ;;  %vm724_vm9 = vcmp.eq.s32.totalorder %v2124_v11, %v716_v10 }
 0x136   : > { %v2123_v14 = vsel %vm717_vm8, 1.0, %v3136_v2  ;;  %v2125_v15 = vsel %vm724_vm9, 1.0, %v3136_v2 }
 0x138   : > { %v729_v13 = vpop.permute.xlu0 %728 }
 0x139   : > { %vm730_vm10 = vcmp.eq.s32.totalorder %v2122_v12, %v729_v13  ;;  %vm733_vm11 = vcmp.eq.s32.totalorder %v2124_v11, %v729_v13 }
 0x13a   : > { %v2126_v16 = vsel %vm730_vm10, 1.0, %v3136_v2  ;;  %v2127_v17 = vsel %vm733_vm11, 1.0, %v3136_v2 }
 0x13b   : > { %v736_v18 = vmul.f32 %v2126_v16, %v2125_v15  ;;  %v737_v19 = vmul.f32 %v2127_v17, %v2123_v14 }
 0x13d   : > { %v738_v20 = vsub.f32 %v2123_v14, %v737_v19  ;;  %v739_v21 = vsub.f32 %v2125_v15, %v736_v18  ;;  %v740_v22 = vsub.f32 %v2126_v16, %v736_v18  ;;  %v741_v23 = vsub.f32 %v2127_v17, %v737_v19 }
 0x13e   : > { %v744_v26 = vpack.c.bf16 %v737_v19, %v736_v18 }
 0x13f   : > { %v742_v24 = vpack.c.bf16 %v739_v21, %v738_v20  ;;  %v743_v25 = vpack.c.bf16 %v741_v23, %v740_v22 }
 0x141   : > { %2367 = vmatmul.mubr.bf16.vlgmr.msra.gmra.mrb[0].mxu0 %v742_v24  ;;  %2371 = vmatmul.mubr.bf16.vlgmr.msra.gmra.mrb[0].mxu1 %v743_v25 }
 0x142   : > { %2374 = vmatprep.mubr.msk.bf16.mxu1 %vm3138_vm6, %v3136_v2 }
 0x149   : > { %2375 = vmatmul.mubr.bf16.gmra.mrb[4].mxu1 %v744_v26 }
 0x214   : > { %v802_v27 = vpop.f32.mrb[0].mxu0  ;;  %v810_v28 = vpop.f32.mrb[0].mxu1 }
 0x215   : > { %v2368_v29 = vpop.f32.mrb[1].mxu0  ;;  %v2372_v30 = vpop.f32.mrb[1].mxu1 }
 0x216   : > { %v805_v31 = vpop.f32.mrb[2].mxu0  ;;  %v813_v32 = vpop.f32.mrb[2].mxu1 }
 0x217   : > { %v2369_v33 = vpop.f32.mrb[3].mxu0  ;;  %v2373_v34 = vpop.f32.mrb[3].mxu1 }
 0x219   : > { %828 = sbr.rel (%p2133_p10) target bundleno = 544 (0x220), region = 112 }
 0x21c   : > { %v818_v35 = vpop.f32.mrb[4].mxu1 }
 0x21d   : > { %v2376_v36 = vpop.f32.mrb[5].mxu1 }
 0x21e   : > { %v821_v37 = vpop.f32.mrb[6].mxu1 }
 0x21f   : > { %v2377_v38 = vpop.f32.mrb[7].mxu1 }
 0x220 PF: > { %v836_v40 = vld [vmem:[#allocation2] sm:$0xff]  ;;  %vm848_vm13 = vcmask 195584   ;;  %v837_v41 = vld [vmem:[#allocation2 + $0x8] sm:$0xff]  ;;  %v838_v42 = vld [vmem:[#allocation2 + $0x10] sm:$0xff]  ;;  %p2134_p13 = scmp.ne.s32.totalorder %s3110_s27, 2 }
 0x221   : > { %v842_v43 = vadd.f32 %v836_v40, %v802_v27  ;;  %v843_v44 = vadd.f32 %v837_v41, %v805_v31  ;;  %v844_v45 = vadd.f32 %v838_v42, %v810_v28  ;;  %v839_v46 = vld [vmem:[#allocation2 + $0x18] sm:$0xff]  ;;  %v840_v47 = vld [vmem:[#allocation2 + $0x20] sm:$0xff]  ;;  %v841_v48 = vld [vmem:[#allocation2 + $0x28] sm:$0xff]  ;;  %v3140_v55 = vmov (!%p2134_p13), 0.0|0.0   ;;  %s3759_s22 = sld [smem:[#allocation29_spill]] (!%p2134_p13)  ;;  %s3760_s16 = sld [smem:[#allocation31_spill]] (!%p2134_p13) }
 0x222   : > { %v845_v49 = vadd.f32 %v839_v46, %v813_v32  ;;  %v846_v50 = vadd.f32 %v840_v47, %v818_v35  ;;  %v847_v51 = vadd.f32 %v841_v48, %v821_v37  ;;  %858 = sbr.rel (%p2134_p13) target bundleno = 2087 (0x827), region = 116  ;;  %v886_v52 = vld [vmem:[#allocation3] sm:$0xff] (!%p2134_p13)  ;;  %v887_v53 = vld [vmem:[#allocation3 + $0x8] sm:$0xff] (!%p2134_p13)  ;;  %v888_v54 = vld [vmem:[#allocation3 + $0x10] sm:$0xff] (!%p2134_p13)  ;;  %2515 = vmatprep.subr.bf16.mxu0 (!%p2134_p13), %v3140_v55  ;;  %vm3141_vm14 = vmmov (!%p2134_p13), 0   ;;  %2539 = vmatprep.subr.bf16.mxu1 (!%p2134_p13), %v3140_v55  ;;  %s3761_s9 = sld [smem:[#allocation32_spill]] (!%p2134_p13) }
 0x223   : > { %849 = vst.msk [vmem:[#allocation2] sm:$0xff] %vm848_vm13, %v842_v43  ;;  %850 = vst.msk [vmem:[#allocation2 + $0x8] sm:$0xff] %vm848_vm13, %v843_v44  ;;  %v2516_v56 = vpack.c.bf16 (!%p2134_p13), %v887_v53, %v886_v52  ;;  %v889_v57 = vld [vmem:[#allocation3 + $0x18] sm:$0xff] (!%p2134_p13)  ;;  %v3142_v58 = vmov (!%p2134_p13), 0.0   ;;  %v890_v60 = vld [vmem:[#allocation3 + $0x20] sm:$0xff] (!%p2134_p13)  ;;  %s3762_s18 = sld [smem:[#allocation33_spill]] (!%p2134_p13) }
 0x224   : > { %851 = vst.msk [vmem:[#allocation2 + $0x10] sm:$0xff] %vm848_vm13, %v844_v45  ;;  %852 = vst.msk [vmem:[#allocation2 + $0x18] sm:$0xff] %vm848_vm13, %v845_v49  ;;  %2410 = vmatprep.mubr.msk.f32.mxu0 (!%p2134_p13), %vm3141_vm14, %v3142_v58  ;;  %2451 = vmatprep.mubr.msk.f32.mxu1 (!%p2134_p13), %vm3141_vm14, %v3142_v58  ;;  %v2519_v59 = vpack.c.bf16 (!%p2134_p13), %v889_v57, %v888_v54  ;;  %v891_v61 = vld [vmem:[#allocation3 + $0x28] sm:$0xff] (!%p2134_p13)  ;;  %v989_v62 = vld [vmem:[#allocation6] sm:$0xff] (!%p2134_p13)  ;;  %s3763_s24 = sld [smem:[#allocation34_spill]] (!%p2134_p13) }
 0x225   : > { %853 = vst.msk [vmem:[#allocation2 + $0x20] sm:$0xff] %vm848_vm13, %v846_v50  ;;  %854 = vst.msk [vmem:[#allocation2 + $0x28] sm:$0xff] %vm848_vm13, %v847_v51  ;;  %2517 = vmatpush3.bf16.msra.mxu0 (!%p2134_p13), %v2516_v56  ;;  %v990_v63 = vld [vmem:[#allocation6 + $0x8] sm:$0xff] (!%p2134_p13)  ;;  %v991_v1 = vld [vmem:[#allocation6 + $0x10] sm:$0xff] (!%p2134_p13)  ;;  %v2522_v2 = vpack.c.bf16 (!%p2134_p13), %v891_v61, %v890_v60 }
 0x226   : > { %2518 = vmatprep.subr.bf16.mxu0 (!%p2134_p13), %v3140_v55  ;;  %v2540_v4 = vpack.c.bf16 (!%p2134_p13), %v990_v63, %v989_v62  ;;  %v992_v5 = vld [vmem:[#allocation6 + $0x18] sm:$0xff] (!%p2134_p13)  ;;  %v892_v6 = vld [vmem:[#allocation3 + $0x30] sm:$0xff] (!%p2134_p13)  ;;  %v993_v9 = vld [vmem:[#allocation6 + $0x20] sm:$0xff] (!%p2134_p13) }
 0x227   : > { %v893_v7 = vld [vmem:[#allocation3 + $0x38] sm:$0xff] (!%p2134_p13)  ;;  %v2543_v8 = vpack.c.bf16 (!%p2134_p13), %v992_v5, %v991_v1  ;;  %v994_v10 = vld [vmem:[#allocation6 + $0x28] sm:$0xff] (!%p2134_p13)  ;;  %v894_v12 = vld [vmem:[#allocation3 + $0x40] sm:$0xff] (!%p2134_p13) }
 0x228   : > { %2541 = vmatpush3.bf16.msra.mxu1 (!%p2134_p13), %v2540_v4  ;;  %v2525_v11 = vpack.c.bf16 (!%p2134_p13), %v893_v7, %v892_v6  ;;  %v895_v13 = vld [vmem:[#allocation3 + $0x48] sm:$0xff] (!%p2134_p13)  ;;  %v2546_v14 = vpack.c.bf16 (!%p2134_p13), %v994_v10, %v993_v9  ;;  %v995_v15 = vld [vmem:[#allocation6 + $0x30] sm:$0xff] (!%p2134_p13)  ;;  %v996_v16 = vld [vmem:[#allocation6 + $0x38] sm:$0xff] (!%p2134_p13)  ;;  %v3143_v4 = vmov (!%p2134_p13), 16  }
 0x229   : > { %2520 = vmatpush3.bf16.msra.mxu0 %v2519_v59  ;;  %2542 = vmatprep.subr.bf16.mxu1 %v3140_v55  ;;  %v2528_v17 = vpack.c.bf16 %v895_v13, %v894_v12  ;;  %v896_v18 = vld [vmem:[#allocation3 + $0x50] sm:$0xff]  ;;  %v897_v19 = vld [vmem:[#allocation3 + $0x58] sm:$0xff]  ;;  %v2549_v20 = vpack.c.bf16 %v996_v16, %v995_v15  ;;  %v997_v21 = vld [vmem:[#allocation6 + $0x40] sm:$0xff] }
 0x22a   : > { %2521 = vmatprep.subr.bf16.mxu0 %v3140_v55  ;;  %v998_v22 = vld [vmem:[#allocation6 + $0x48] sm:$0xff]  ;;  %v2531_v23 = vpack.c.bf16 %v897_v19, %v896_v18  ;;  %v898_v24 = vld [vmem:[#allocation3 + $0x60] sm:$0xff]  ;;  %v999_v27 = vld [vmem:[#allocation6 + $0x50] sm:$0xff]  ;;  %2861 = vset.pattern.permute.xlu0 %v3143_v4 }
 0x22b   : > { %v899_v25 = vld [vmem:[#allocation3 + $0x68] sm:$0xff]  ;;  %v2552_v26 = vpack.c.bf16 %v998_v22, %v997_v21  ;;  %v1000_v28 = vld [vmem:[#allocation6 + $0x58] sm:$0xff]  ;;  %v900_v30 = vld [vmem:[#allocation3 + $0x70] sm:$0xff]  ;;  %2862 = vset.pattern.permute.xlu1 %v3143_v4 }
 0x22c   : > { %2544 = vmatpush3.bf16.msra.mxu1 %v2543_v8  ;;  %v2534_v29 = vpack.c.bf16 %v899_v25, %v898_v24  ;;  %v901_v31 = vld [vmem:[#allocation3 + $0x78] sm:$0xff]  ;;  %v2555_v32 = vpack.c.bf16 %v1000_v28, %v999_v27  ;;  %v1001_v33 = vld [vmem:[#allocation6 + $0x60] sm:$0xff]  ;;  %v1002_v34 = vld [vmem:[#allocation6 + $0x68] sm:$0xff] }
 0x22d   : > { %2523 = vmatpush3.bf16.msra.mxu0 %v2522_v2  ;;  %2545 = vmatprep.subr.bf16.mxu1 %v3140_v55  ;;  %v2537_v35 = vpack.c.bf16 %v901_v31, %v900_v30  ;;  %v2558_v36 = vpack.c.bf16 %v1002_v34, %v1001_v33  ;;  %v883_v37 = vld [vmem:[%s3702_s6] sm:$0xff]  ;;  %v884_v38 = vld [vmem:[%s3702_s6 + $0x8] sm:$0xff]  ;;  %v1003_v39 = vld [vmem:[#allocation6 + $0x70] sm:$0xff] }
 0x22e   : > { %2524 = vmatprep.subr.bf16.mxu0 %v3140_v55  ;;  %v1004_v40 = vld [vmem:[#allocation6 + $0x78] sm:$0xff]  ;;  %v885_v49 = vld [vmem:[%s3702_s6 + $0x10] sm:$0xff]  ;;  %v3545_v50 = vld [vmem:[#allocation2] sm:$0xff] }
 0x22f   : > { %v2561_v41 = vpack.c.bf16 %v1004_v40, %v1003_v39  ;;  %v3534_v42 = vld [vmem:[%s3759_s22] ss:$0 sm:$0xff]  ;;  %v865_v53 = vadd.f32 1e-30, %v3545_v50  ;;  %v3553_v54 = vld [vmem:[#allocation2 + $0x10] sm:$0xff]  ;;  %v3555_v56 = vld [vmem:[#allocation2 + $0x18] sm:$0xff] }
 0x230   : > { %2547 = vmatpush3.bf16.msra.mxu1 %v2546_v14  ;;  %v3547_v51 = vld [vmem:[#allocation2 + $0x8] sm:$0xff]  ;;  %v867_v57 = vadd.f32 1e-30, %v3553_v54  ;;  %v868_v59 = vadd.f32 1e-30, %v3555_v56  ;;  %v3559_v60 = vld [vmem:[#allocation2 + $0x20] sm:$0xff] }
 0x231   : > { %2526 = vmatpush3.bf16.msra.mxu0 %v2525_v11  ;;  %2548 = vmatprep.subr.bf16.mxu1 %v3140_v55  ;;  %v866_v52 = vadd.f32 1e-30, %v3547_v51  ;;  %v3561_v61 = vld [vmem:[#allocation2 + $0x28] sm:$0xff]  ;;  %v869_v62 = vadd.f32 1e-30, %v3559_v60  ;;  %v1269_v1 = vld [vmem:[#allocation8 + $0x80] sm:$0xff] }
 0x232   : > { %2527 = vmatprep.subr.bf16.mxu0 %v3140_v55  ;;  %v870_v63 = vadd.f32 1e-30, %v3561_v61  ;;  %v1270_v2 = vld [vmem:[#allocation8 + $0x88] sm:$0xff]  ;;  %v1253_v6 = vld [vmem:[#allocation8] sm:$0xff]  ;;  %v1271_v8 = vld [vmem:[#allocation8 + $0x90] sm:$0xff] }
 0x233   : > { %2866 = vrcp.f32 %v866_v52  ;;  %v2567_v5 = vpack.c.bf16 %v1270_v2, %v1269_v1  ;;  %v1254_v7 = vld [vmem:[#allocation8 + $0x8] sm:$0xff]  ;;  %v1272_v10 = vld [vmem:[#allocation8 + $0x98] sm:$0xff]  ;;  %v1255_v13 = vld [vmem:[#allocation8 + $0x10] sm:$0xff] }
 0x234   : > { %2550 = vmatpush3.bf16.msra.mxu1 %v2549_v20  ;;  %2868 = vrcp.f32 %v865_v53  ;;  %v2569_v9 = vpack.c.bf16 %v1254_v7, %v1253_v6  ;;  %v2571_v12 = vpack.c.bf16 %v1272_v10, %v1271_v8  ;;  %v1256_v14 = vld [vmem:[#allocation8 + $0x18] sm:$0xff]  ;;  %v1273_v16 = vld [vmem:[#allocation8 + $0xa0] sm:$0xff]  ;;  %v1258_v22 = vld [vmem:[#allocation8 + $0x28] sm:$0xff] }
 0x235   : > { %2529 = vmatpush3.bf16.msra.mxu0 %v2528_v17  ;;  %2551 = vmatprep.subr.bf16.mxu1 %v3140_v55  ;;  %2870 = vrcp.f32 %v868_v59  ;;  %v2573_v15 = vpack.c.bf16 %v1256_v14, %v1255_v13  ;;  %v1274_v17 = vld [vmem:[#allocation8 + $0xa8] sm:$0xff]  ;;  %v1257_v20 = vld [vmem:[#allocation8 + $0x20] sm:$0xff]  ;;  %v1276_v24 = vld [vmem:[#allocation8 + $0xb8] sm:$0xff] }
 0x236   : > { %2530 = vmatprep.subr.bf16.mxu0 %v3140_v55  ;;  %2872 = vrcp.f32 %v867_v57  ;;  %v2575_v19 = vpack.c.bf16 %v1274_v17, %v1273_v16  ;;  %v1259_v28 = vld [vmem:[#allocation8 + $0x30] sm:$0xff]  ;;  %v1277_v31 = vld [vmem:[#allocation8 + $0xc0] sm:$0xff]  ;;  %v1280_v40 = vld [vmem:[#allocation8 + $0xd8] sm:$0xff] }
 0x237   : > { %2874 = vrcp.f32 %v870_v63  ;;  %v1279_v39 = vld [vmem:[#allocation8 + $0xd0] sm:$0xff]  ;;  %v1266_v59 = vld [vmem:[#allocation8 + $0x68] sm:$0xff]  ;;  %v1301_v10 = vld [vmem:[#allocation8 + $0x180] sm:$0xff] }
 0x238   : > { %2553 = vmatpush3.bf16.msra.mxu1 %v2552_v26  ;;  %2876 = vrcp.f32 %v869_v62  ;;  %v2577_v26 = vpack.c.bf16 %v1258_v22, %v1257_v20  ;;  %v1283_v2 = vld [vmem:[#allocation8 + $0xf0] sm:$0xff]  ;;  %v1285_v17 = vld [vmem:[#allocation8 + $0x100] sm:$0xff]  ;;  %v1304_v20 = vld [vmem:[#allocation8 + $0x198] sm:$0xff] }
 0x239   : > { %2532 = vmatpush3.bf16.msra.mxu0 %v2531_v23  ;;  %2554 = vmatprep.subr.bf16.mxu1 %v3140_v55  ;;  %v1275_v23 = vld [vmem:[#allocation8 + $0xb0] sm:$0xff] }
 0x23a   : > { %2533 = vmatprep.subr.bf16.mxu0 %v3140_v55  ;;  %v2579_v27 = vpack.c.bf16 %v1276_v24, %v1275_v23  ;;  %v1287_v23 = vld [vmem:[#allocation8 + $0x110] sm:$0xff]  ;;  %v1288_v24 = vld [vmem:[#allocation8 + $0x118] sm:$0xff] }
 0x23c   : > { %2556 = vmatpush3.bf16.msra.mxu1 %v2555_v32  ;;  %v1278_v32 = vld [vmem:[#allocation8 + $0xc8] sm:$0xff] }
 0x23d   : > { %2535 = vmatpush3.bf16.msra.mxu0 %v2534_v29  ;;  %2557 = vmatprep.subr.bf16.mxu1 %v3140_v55  ;;  %v2867_v11 = vpop.eup %2866  ;;  %v1260_v29 = vld [vmem:[#allocation8 + $0x38] sm:$0xff] }
 0x23e   : > { %2536 = vmatprep.subr.bf16.mxu0 %v3140_v55  ;;  %1224 = vperm.xlu0 %2861, %v2867_v11   ;;  %v2869_v18 = vpop.eup %2868  ;;  %v2581_v34 = vpack.c.bf16 %v1260_v29, %v1259_v28  ;;  %v878_v52 = vmul.f32 %v2867_v11, %v3547_v51  ;;  %v1302_v11 = vld [vmem:[#allocation8 + $0x188] sm:$0xff]  ;;  %v2605_v28 = vpack.c.bf16 %v1288_v24, %v1287_v23 }
 0x23f   : > { %v2871_v21 = vpop.eup %2870  ;;  %v2599_v16 = vpack.c.bf16 %v1302_v11, %v1301_v10  ;;  %v1333_v10 = vld [vmem:[#allocation8 + $0x280] sm:$0xff]  ;;  %v1318_v23 = vld [vmem:[#allocation8 + $0x208] sm:$0xff] }
 0x240   : > { %2559 = vmatpush3.bf16.msra.mxu1 %v2558_v36  ;;  %1234 = vperm.xlu1 %2862, %v2871_v21   ;;  %v3567_v25 = vpop.eup %2872  ;;  %v1261_v36 = vld [vmem:[#allocation8 + $0x40] sm:$0xff]  ;;  %v880_v62 = vmul.f32 %v2871_v21, %v3555_v56 }
 0x241   : > { %2538 = vmatpush3.bf16.msra.mxu0 %v2537_v35  ;;  %2560 = vmatprep.subr.bf16.mxu1 %v3140_v55  ;;  %v3569_v30 = vpop.eup %2874  ;;  %v2583_v35 = vpack.c.bf16 %v1278_v32, %v1277_v31  ;;  %v1289_v31 = vld [vmem:[#allocation8 + $0x120] sm:$0xff]  ;;  %v1290_v32 = vld [vmem:[#allocation8 + $0x128] sm:$0xff] }
 0x242   : > { %1219 = vperm.xlu0 %2861, %v2869_v18   ;;  %v2877_v33 = vpop.eup %2876 }
 0x243   : > { %v881_v1 = vmul.f32 %v2877_v33, %v3559_v60 }
 0x244   : > { %2411 = vmatmul.mubr.f32.vlgmr.msra.gmra.mrb[0].mxu0 %v883_v37  ;;  %2562 = vmatpush3.bf16.msra.mxu1 %v2561_v41  ;;  %v1262_v37 = vld [vmem:[#allocation8 + $0x48] sm:$0xff]  ;;  %v877_v41 = vmul.f32 %v2869_v18, %v3545_v50 }
 0x245   : > { %2413 = vmatprep.mubr.msk.f32.mxu0 %vm3141_vm14, %v3142_v58  ;;  %2568 = vmatprep.subr.bf16.mxu1 %v2567_v5  ;;  %v1284_v5 = vld [vmem:[#allocation8 + $0xf8] sm:$0xff]  ;;  %v1286_v18 = vld [vmem:[#allocation8 + $0x108] sm:$0xff] }
 0x246   : > { %1229 = vperm.xlu1 %2862, %v3567_v25   ;;  %1244 = vperm.xlu0 %2861, %v3569_v30   ;;  %v2595_v6 = vpack.c.bf16 %v1284_v5, %v1283_v2  ;;  %v2601_v21 = vpack.c.bf16 %v1286_v18, %v1285_v17  ;;  %v1268_v2 = vld [vmem:[#allocation8 + $0x78] sm:$0xff]  ;;  %v1297_v5 = vld [vmem:[#allocation8 + $0x160] sm:$0xff]  ;;  %v882_v18 = vmul.f32 %v3569_v30, %v3561_v61 }
 0x248   : > { %2414 = vmatmul.mubr.f32.gmra.mrb[2].mxu0 %v884_v38  ;;  %v1626_v38 = vld [vmem:[%s704_s17] sm:$0xff] }
 0x249   : > { %2416 = vmatprep.mubr.msk.f32.mxu0 %vm3141_vm14, %v3142_v58 }
 0x24a   : > { %1239 = vperm.xlu1 %2862, %v2877_v33   ;;  %v1307_v33 = vld [vmem:[#allocation8 + $0x1b0] sm:$0xff] }
 0x24c   : > { %2417 = vmatmul.mubr.f32.gmra.mrb[4].mxu0 %v885_v49  ;;  %v1282_v49 = vld [vmem:[#allocation8 + $0xe8] sm:$0xff] }
 0x24d   : > { %2464 = vmatprep.mubr.msk.f32.mxu0 %vm848_vm13, %v3545_v50  ;;  %v1265_v50 = vld [vmem:[#allocation8 + $0x60] sm:$0xff] }
 0x24e   : > { %1352 = vperm.xlu1 %2862, %v877_v41   ;;  %v2593_v63 = vpack.c.bf16 %v1266_v59, %v1265_v50 }
 0x252   : > { %1572 = vperm.xlu1 %2862, %v878_v52   ;;  %v1313_v52 = vld [vmem:[#allocation8 + $0x1e0] sm:$0xff] }
 0x256   : > { %1594 = vperm.xlu1 %2862, %v880_v62  }
 0x25a   : > { %1605 = vperm.xlu1 %2862, %v881_v1   ;;  %v1267_v1 = vld [vmem:[#allocation8 + $0x70] sm:$0xff] }
 0x317   : > { %v975_v43 = vpop.f32.mrb[0].mxu0 }
 0x318   : > { %v976_v44 = vadd.f32 %v3534_v42, %v975_v43  ;;  %v2412_v45 = vpop.f32.mrb[1].mxu0  ;;  %v3144_v43 = vmov 0  }
 0x319   : > { %2863 = vset.pattern.permute.xlu0 %v3144_v43  ;;  %v2587_v45 = vpack.c.bf16 %v1280_v40, %v1279_v39  ;;  %v1310_v39 = vld [vmem:[#allocation8 + $0x1c8] sm:$0xff] }
 0x31a   : > { %2452 = vmatmul.mubr.f32.vlgmr.msra.gmra.mrb[0].mxu1 %v976_v44  ;;  %v2585_v44 = vpack.c.bf16 %v1262_v37, %v1261_v36  ;;  %1630 = vperm.xlu0 %2863, %v1626_v38   ;;  %v1291_v36 = vld [vmem:[#allocation8 + $0x130] sm:$0xff]  ;;  %v1292_v37 = vld [vmem:[#allocation8 + $0x138] sm:$0xff]  ;;  %v1309_v38 = vld [vmem:[#allocation8 + $0x1c0] sm:$0xff] }
 0x31b   : > { %v980_v46 = vpop.f32.mrb[2].mxu0  ;;  %2454 = vmatprep.mubr.msk.f32.mxu1 %vm3141_vm14, %v3142_v58  ;;  %2570 = vmatpush3.bf16.msra.mxu1 %v2569_v9  ;;  %v2613_v40 = vpack.c.bf16 %v1292_v37, %v1291_v36  ;;  %v2615_v41 = vpack.c.bf16 %v1310_v39, %v1309_v38 }
 0x31c   : > { %v981_v47 = vadd.f32 %v3534_v42, %v980_v46  ;;  %v2415_v48 = vpop.f32.mrb[3].mxu0  ;;  %2572 = vmatprep.subr.bf16.mxu1 %v2571_v12  ;;  %v1263_v46 = vld [vmem:[#allocation8 + $0x50] sm:$0xff] }
 0x31d   : > { %v1281_v48 = vld [vmem:[#allocation8 + $0xe0] sm:$0xff] }
 0x31e   : > { %2455 = vmatmul.mubr.f32.gmra.mrb[2].mxu1 %v981_v47  ;;  %v1264_v47 = vld [vmem:[#allocation8 + $0x58] sm:$0xff]  ;;  %v2591_v57 = vpack.c.bf16 %v1282_v49, %v1281_v48  ;;  %2864 = vset.pattern.permute.xlu0 %v3143_v4  ;;  %v1295_v48 = vld [vmem:[#allocation8 + $0x150] sm:$0xff] }
 0x31f   : > { %2457 = vmatprep.mubr.msk.f32.mxu1 %vm3141_vm14, %v3142_v58  ;;  %2574 = vmatpush3.bf16.msra.mxu1 %v2573_v15  ;;  %v2589_v53 = vpack.c.bf16 %v1264_v47, %v1263_v46  ;;  %v2136_v4 = vld [vmem:[%s3760_s16] ss:$0 sm:$0xff]  ;;  %v985_v59 = vpop.f32.mrb[4].mxu0 }
 0x320   : > { %2576 = vmatprep.subr.bf16.mxu1 %v2575_v19  ;;  %v1303_v19 = vld [vmem:[#allocation8 + $0x190] sm:$0xff]  ;;  %v1312_v46 = vld [vmem:[#allocation8 + $0x1d8] sm:$0xff]  ;;  %v986_v62 = vadd.f32 %v3534_v42, %v985_v59  ;;  %v879_v42 = vmul.f32 %v3567_v25, %v3553_v54  ;;  %v1342_v59 = vld [vmem:[#allocation8 + $0x2c8] sm:$0xff] }
 0x321   : > { %v2603_v22 = vpack.c.bf16 %v1304_v20, %v1303_v19  ;;  %v1296_v49 = vld [vmem:[#allocation8 + $0x158] sm:$0xff]  ;;  %v1225_v19 = vpop.permute.xlu0 %1224 }
 0x322   : > { %2458 = vmatmul.mubr.f32.gmra.mrb[4].mxu1 %v986_v62  ;;  %1583 = vperm.xlu0 %2864, %v879_v42  }
 0x323   : > { %2578 = vmatpush3.bf16.msra.mxu1 %v2577_v26  ;;  %v1305_v26 = vld [vmem:[#allocation8 + $0x1a0] sm:$0xff] }
 0x324   : > { %2580 = vmatprep.subr.bf16.mxu1 %v2579_v27  ;;  %v1306_v27 = vld [vmem:[#allocation8 + $0x1a8] sm:$0xff] }
 0x325   : > { %v2607_v29 = vpack.c.bf16 %v1306_v27, %v1305_v26  ;;  %v1220_v20 = vpop.permute.xlu0 %1219  ;;  %v1335_v26 = vld [vmem:[#allocation8 + $0x290] sm:$0xff]  ;;  %v1336_v27 = vld [vmem:[#allocation8 + $0x298] sm:$0xff] }
 0x326   : > { %1616 = vperm.xlu0 %2864, %v882_v18   ;;  %v2635_v25 = vpack.c.bf16 %v1336_v27, %v1335_v26  ;;  %v1724_v27 = vld [vmem:[#allocation9 + $0x80] sm:$0xff] }
 0x327   : > { %2582 = vmatpush3.bf16.msra.mxu1 %v2581_v34  ;;  %v1308_v34 = vld [vmem:[#allocation8 + $0x1b8] sm:$0xff] }
 0x328   : > { %2584 = vmatprep.subr.bf16.mxu1 %v2583_v35  ;;  %v2609_v35 = vpack.c.bf16 %v1290_v32, %v1289_v31 }
 0x329   : > { %v1245_v24 = vpop.permute.xlu0 %1244 }
 0x32a   : > { %2865 = vset.pattern.permute.xlu0 %v3144_v43  ;;  %v1337_v43 = vld [vmem:[#allocation8 + $0x2a0] sm:$0xff] }
 0x32b   : > { %2586 = vmatpush3.bf16.msra.mxu1 %v2585_v44  ;;  %v1293_v44 = vld [vmem:[#allocation8 + $0x140] sm:$0xff] }
 0x32c   : > { %2588 = vmatprep.subr.bf16.mxu1 %v2587_v45  ;;  %v1311_v45 = vld [vmem:[#allocation8 + $0x1d0] sm:$0xff] }
 0x32d   : > { %v2619_v47 = vpack.c.bf16 %v1312_v46, %v1311_v45  ;;  %v1339_v45 = vld [vmem:[#allocation8 + $0x2b0] sm:$0xff] }
 0x32f   : > { %2590 = vmatpush3.bf16.msra.mxu1 %v2589_v53  ;;  %v1314_v53 = vld [vmem:[#allocation8 + $0x1e8] sm:$0xff] }
 0x330   : > { %2592 = vmatprep.subr.bf16.mxu1 %v2591_v57  ;;  %v2621_v57 = vpack.c.bf16 %v1296_v49, %v1295_v48  ;;  %v2623_v50 = vpack.c.bf16 %v1314_v53, %v1313_v52  ;;  %v1323_v53 = vld [vmem:[#allocation8 + $0x230] sm:$0xff] }
 0x333   : > { %2594 = vmatpush3.bf16.msra.mxu1 %v2593_v63  ;;  %v2418_v63 = vpop.f32.mrb[5].mxu0 }
 0x334   : > { %2596 = vmatprep.subr.bf16.mxu1 %v2595_v6  ;;  %v2597_v6 = vpack.c.bf16 %v1268_v2, %v1267_v1  ;;  %v1325_v63 = vld [vmem:[#allocation8 + $0x240] sm:$0xff]  ;;  %v1326_v1 = vld [vmem:[#allocation8 + $0x248] sm:$0xff]  ;;  %v1343_v2 = vld [vmem:[#allocation8 + $0x2d0] sm:$0xff] }
 0x337   : > { %2598 = vmatpush3.bf16.msra.mxu1 %v2597_v6  ;;  %v2649_v6 = vpack.c.bf16 %v1326_v1, %v1325_v63  ;;  %v1737_v63 = vld [vmem:[#allocation9 + $0xe8] sm:$0xff] }
 0x3ed   : > { %v1078_v7 = vpop.f32.mrb[0].mxu1 }
 0x3ee   : > { %v2453_v8 = vpop.f32.mrb[1].mxu1  ;;  %v1079_v12 = vadd.f32 %v2136_v4, %v1078_v7  ;;  %v1298_v7 = vld [vmem:[#allocation8 + $0x168] sm:$0xff] }
 0x3ef   : > { %v2625_v8 = vpack.c.bf16 %v1298_v7, %v1297_v5  ;;  %v1344_v5 = vld [vmem:[#allocation8 + $0x2d8] sm:$0xff] }
 0x3f0   : > { %v2651_v7 = vpack.c.bf16 %v1344_v5, %v1343_v2  ;;  %v1720_v2 = vld [vmem:[#allocation9 + $0x60] sm:$0xff]  ;;  %v1721_v5 = vld [vmem:[#allocation9 + $0x68] sm:$0xff] }
 0x3f1   : > { %v1083_v9 = vpop.f32.mrb[2].mxu1 }
 0x3f2   : > { %v1084_v13 = vadd.f32 %v2136_v4, %v1083_v9  ;;  %v2456_v14 = vpop.f32.mrb[3].mxu1  ;;  %v1315_v4 = vld [vmem:[#allocation8 + $0x1f0] sm:$0xff]  ;;  %v1316_v9 = vld [vmem:[#allocation8 + $0x1f8] sm:$0xff] }
 0x3f3   : > { %v2627_v11 = vpack.c.bf16 %v1316_v9, %v1315_v4  ;;  %v1300_v14 = vld [vmem:[#allocation8 + $0x178] sm:$0xff]  ;;  %v1345_v9 = vld [vmem:[#allocation8 + $0x2e0] sm:$0xff] }
 0x3f4   : > { %v3587_v15 = vpack.c.bf16 %v1084_v13, %v1079_v12  ;;  %v1334_v12 = vld [vmem:[#allocation8 + $0x288] sm:$0xff]  ;;  %v1299_v13 = vld [vmem:[#allocation8 + $0x170] sm:$0xff]  ;;  %v1328_v4 = vld [vmem:[#allocation8 + $0x258] sm:$0xff] }
 0x3f5   : > { %v2629_v17 = vpack.c.bf16 %v1300_v14, %v1299_v13  ;;  %v1329_v13 = vld [vmem:[#allocation8 + $0x260] sm:$0xff]  ;;  %v1330_v14 = vld [vmem:[#allocation8 + $0x268] sm:$0xff] }
 0x3f6   : > { %2564 = vmatprep.subr.bf16.mxu0 %v3587_v15  ;;  %v2657_v42 = vpack.c.bf16 %v1330_v14, %v1329_v13  ;;  %v1349_v13 = vld [vmem:[%s3761_s9] sm:$0x3f] }
 0x3f7   : > { %2566 = vmatpush3.bf16.msra.mxu0 %v3587_v15 }
 0x3f8   : > { %2600 = vmatprep.subr.bf16.mxu0 %v2599_v16  ;;  %v2631_v16 = vpack.c.bf16 %v1334_v12, %v1333_v10  ;;  %v1346_v10 = vld [vmem:[#allocation8 + $0x2e8] sm:$0xff] }
 0x3f9   : > { %v2655_v12 = vpack.c.bf16 %v1346_v10, %v1345_v9  ;;  %v1722_v9 = vld [vmem:[#allocation9 + $0x70] sm:$0xff]  ;;  %v1723_v10 = vld [vmem:[#allocation9 + $0x78] sm:$0xff] }
 0x3fa   : > { %2465 = vmatmul.mubr.msk.f32.vlgmr.msra.gmra.mrb[6].mxu0 %vm848_vm13, %v3547_v51  ;;  %v2611_v51 = vpack.c.bf16 %v1308_v34, %v1307_v33  ;;  %2632 = vmatprep.subr.bf16.mxu1 %v2631_v16  ;;  %v1319_v33 = vld [vmem:[#allocation8 + $0x210] sm:$0xff]  ;;  %v1320_v34 = vld [vmem:[#allocation8 + $0x218] sm:$0xff] }
 0x3fb   : > { %2467 = vmatprep.mubr.msk.f32.mxu0 %vm848_vm13, %v3553_v54  ;;  %2602 = vmatpush3.bf16.msra.mxu0 %v2601_v21  ;;  %v1235_v21 = vpop.permute.xlu1 %1234  ;;  %v2637_v39 = vpack.c.bf16 %v1320_v34, %v1319_v33  ;;  %v1347_v16 = vld [vmem:[#allocation8 + $0x2f0] sm:$0xff] }
 0x3fc   : > { %2604 = vmatprep.subr.bf16.mxu0 %v2603_v22  ;;  %v1317_v22 = vld [vmem:[#allocation8 + $0x200] sm:$0xff] }
 0x3fd   : > { %v2633_v32 = vpack.c.bf16 %v1318_v23, %v1317_v22 }
 0x3fe   : > { %2468 = vmatmul.mubr.msk.f32.gmra.mrb[8].mxu0 %vm848_vm13, %v3555_v56  ;;  %v1294_v56 = vld [vmem:[#allocation8 + $0x148] sm:$0xff] }
 0x3ff   : > { %2470 = vmatprep.mubr.msk.f32.mxu0 %vm848_vm13, %v3559_v60  ;;  %2606 = vmatpush3.bf16.msra.mxu0 %v2605_v28  ;;  %v2617_v60 = vpack.c.bf16 %v1294_v56, %v1293_v44  ;;  %v1230_v30 = vpop.permute.xlu1 %1229  ;;  %v1321_v44 = vld [vmem:[#allocation8 + $0x220] sm:$0xff]  ;;  %v1322_v56 = vld [vmem:[#allocation8 + $0x228] sm:$0xff] }
 0x400   : > { %2608 = vmatprep.subr.bf16.mxu0 %v2607_v29 }
 0x402   : > { %2471 = vmatmul.mubr.msk.f32.gmra.mrb[10].mxu0 %vm848_vm13, %v3561_v61  ;;  %v1628_v61 = vand.u32 127, %v746_v0  ;;  %v1340_v0 = vld [vmem:[#allocation8 + $0x2b8] sm:$0xff] }
 0x403   : > { %2610 = vmatpush3.bf16.msra.mxu0 %v2609_v35  ;;  %v1338_v35 = vld [vmem:[#allocation8 + $0x2a8] sm:$0xff]  ;;  %v2643_v52 = vpack.c.bf16 %v1340_v0, %v1339_v45  ;;  %v1240_v22 = vpop.permute.xlu1 %1239  ;;  %v1732_v0 = vld [vmem:[#allocation9 + $0xc0] sm:$0xff] }
 0x404   : > { %2612 = vmatprep.subr.bf16.mxu0 %v2611_v51  ;;  %v1631_v51 = vpop.permute.xlu0 %1630 }
 0x405   : > { %vm1632_vm15 = vcmp.eq.s32.totalorder %v1628_v61, %v1631_v51  ;;  %v1710_v61 = vld [vmem:[#allocation9 + $0x10] sm:$0xff] }
 0x406   : > { %v2143_v49 = vsel %vm1632_vm15, 1.0, %v3142_v58 }
 0x407   : > { %2614 = vmatpush3.bf16.msra.mxu0 %v2613_v40 }
 0x408   : > { %2616 = vmatprep.subr.bf16.mxu0 %v2615_v41  ;;  %v2639_v41 = vpack.c.bf16 %v1338_v35, %v1337_v43  ;;  %v1728_v43 = vld [vmem:[#allocation9 + $0xa0] sm:$0xff]  ;;  %v1729_v35 = vld [vmem:[#allocation9 + $0xa8] sm:$0xff] }
 0x40b   : > { %2618 = vmatpush3.bf16.msra.mxu0 %v2617_v60 }
 0x40c   : > { %2620 = vmatprep.subr.bf16.mxu0 %v2619_v47  ;;  %v2641_v47 = vpack.c.bf16 %v1322_v56, %v1321_v44  ;;  %v1714_v44 = vld [vmem:[#allocation9 + $0x30] sm:$0xff]  ;;  %v1715_v56 = vld [vmem:[#allocation9 + $0x38] sm:$0xff] }
 0x40d   : > { %v2680_v45 = vpack.c.bf16 %v1715_v56, %v1714_v44 }
 0x40f   : > { %2622 = vmatpush3.bf16.msra.mxu0 %v2621_v57  ;;  %v1324_v57 = vld [vmem:[#allocation8 + $0x238] sm:$0xff] }
 0x410   : > { %2624 = vmatprep.subr.bf16.mxu0 %v2623_v50  ;;  %v1341_v50 = vld [vmem:[#allocation8 + $0x2c0] sm:$0xff]  ;;  %v2645_v62 = vpack.c.bf16 %v1324_v57, %v1323_v53  ;;  %v1735_v53 = vld [vmem:[#allocation9 + $0xd8] sm:$0xff] }
 0x413   : > { %2626 = vmatpush3.bf16.msra.mxu0 %v2625_v8  ;;  %v1327_v8 = vld [vmem:[#allocation8 + $0x250] sm:$0xff] }
 0x414   : > { %2628 = vmatprep.subr.bf16.mxu0 %v2627_v11  ;;  %v2653_v11 = vpack.c.bf16 %v1328_v4, %v1327_v8  ;;  %v1739_v8 = vld [vmem:[#allocation9 + $0xf8] sm:$0xff] }
 0x417   : > { %2630 = vmatpush3.bf16.msra.mxu0 %v2629_v17  ;;  %v1348_v17 = vld [vmem:[#allocation8 + $0x2f8] sm:$0xff] }
 0x418   : > { %2663 = vmatprep.subr.bf16.mxu0 %v3140_v55  ;;  %v2659_v18 = vpack.c.bf16 %v1348_v17, %v1347_v16 }
 0x4cd   : > { %v2466_v28 = vpop.f32.mrb[6].mxu0 }
 0x4ce   : > { %v1248_v29 = vmul.f32 %v2466_v28, %v1225_v19  ;;  %v1188_v31 = vpop.f32.mrb[7].mxu0  ;;  %v1331_v19 = vld [vmem:[#allocation8 + $0x270] sm:$0xff]  ;;  %v1725_v28 = vld [vmem:[#allocation9 + $0x88] sm:$0xff] }
 0x4cf   : > { %v1247_v54 = vmul.f32 %v1220_v20, %v1188_v31  ;;  %v1332_v20 = vld [vmem:[#allocation8 + $0x278] sm:$0xff]  ;;  %v2666_v31 = vpack.c.bf16 %v1725_v28, %v1724_v27 }
 0x4d0   : > { %1424 = vmatprep.mubr.f32.mxu1 %v1248_v29  ;;  %v1708_v29 = vld [vmem:[#allocation9] sm:$0xff] }
 0x4d1   : > { %v2469_v36 = vpop.f32.mrb[8].mxu0  ;;  %1425 = vmatmul.mubr.f32.vlgmr.msra.gmra.mrb[6].mxu1 %v1247_v54  ;;  %v1726_v54 = vld [vmem:[#allocation9 + $0x90] sm:$0xff] }
 0x4d2   : > { %v1250_v37 = vmul.f32 %v2469_v36, %v1235_v21  ;;  %2634 = vmatpush3.bf16.msra.mxu1 %v2633_v32  ;;  %v1198_v38 = vpop.f32.mrb[9].mxu0  ;;  %v2661_v21 = vpack.c.bf16 %v1332_v20, %v1331_v19  ;;  %v1709_v32 = vld [vmem:[#allocation9 + $0x8] sm:$0xff]  ;;  %v1712_v36 = vld [vmem:[#allocation9 + $0x20] sm:$0xff] }
 0x4d3   : > { %v1249_v40 = vmul.f32 %v1230_v30, %v1198_v38  ;;  %2636 = vmatprep.subr.bf16.mxu1 %v2635_v25  ;;  %v1727_v25 = vld [vmem:[#allocation9 + $0x98] sm:$0xff]  ;;  %v2668_v33 = vpack.c.bf16 %v1709_v32, %v1708_v29  ;;  %v1730_v38 = vld [vmem:[#allocation9 + $0xb0] sm:$0xff]  ;;  %v1577_v29 = vsub.s32 1, %v3455_v3  ;;  %v1599_v32 = vsub.s32 3, %v3455_v3 }
 0x4d4   : > { %1494 = vmatprep.mubr.f32.mxu0 %v1250_v37  ;;  %v2670_v34 = vpack.c.bf16 %v1727_v25, %v1726_v54  ;;  %v1711_v30 = vld [vmem:[#allocation9 + $0x18] sm:$0xff]  ;;  %v1713_v37 = vld [vmem:[#allocation9 + $0x28] sm:$0xff] }
 0x4d5   : > { %v2472_v46 = vpop.f32.mrb[10].mxu0  ;;  %1495 = vmatmul.mubr.f32.vlgmr.msra.gmra.mrb[12].mxu0 %v1249_v40  ;;  %v2672_v51 = vpack.c.bf16 %v1711_v30, %v1710_v61  ;;  %v2676_v40 = vpack.c.bf16 %v1713_v37, %v1712_v36  ;;  %v1578_v54 = vrot.slane %v1349_v13, %v1577_v29  ;;  %v1610_v30 = vsub.s32 4, %v3455_v3 }
 0x4d6   : > { %v1252_v60 = vmul.f32 %v2472_v46, %v1245_v24  ;;  %2638 = vmatpush3.bf16.msra.mxu1 %v2637_v39  ;;  %2665 = vmatpush3.bf16.msra.mxu0 %v3587_v15  ;;  %v1208_v48 = vpop.f32.mrb[11].mxu0  ;;  %v2647_v15 = vpack.c.bf16 %v1342_v59, %v1341_v50  ;;  %v1088_v24 = vpop.f32.mrb[4].mxu1  ;;  %v1731_v39 = vld [vmem:[#allocation9 + $0xb8] sm:$0xff]  ;;  %v1733_v46 = vld [vmem:[#allocation9 + $0xc8] sm:$0xff]  ;;  %v1718_v50 = vld [vmem:[#allocation9 + $0x50] sm:$0xff] }
 0x4d7   : > { %2640 = vmatprep.subr.bf16.mxu1 %v2639_v41  ;;  %2477 = vmatprep.mubr.msk.f32.mxu0 %vm3141_vm14, %v3142_v58  ;;  %v1251_v23 = vmul.f32 %v1240_v22, %v1208_v48  ;;  %v2459_v26 = vpop.f32.mrb[5].mxu1  ;;  %v2678_v41 = vpack.c.bf16 %v1731_v39, %v1730_v38  ;;  %v1717_v48 = vld [vmem:[#allocation9 + $0x48] sm:$0xff]  ;;  %v1719_v59 = vld [vmem:[#allocation9 + $0x58] sm:$0xff]  ;;  %v1621_v38 = vsub.s32 5, %v3455_v3  ;;  %v1611_v39 = vrot.slane %v1349_v13, %v1610_v30 }
 0x4d8   : > { %1564 = vmatprep.mubr.f32.mxu1 %v1252_v60  ;;  %2667 = vmatprep.subr.bf16.mxu0 %v2666_v31  ;;  %v2682_v60 = vpack.c.bf16 %v1733_v46, %v1732_v0  ;;  %v1588_v31 = vsub.s32 2, %v3455_v3 }
 0x4d9   : > { %2478 = vmatmul.mubr.msk.f32.vlgmr.msra.gmra.mrb[14].mxu0 %vm848_vm13, %v2143_v49 }
 0x4da   : > { %2642 = vmatpush3.bf16.msra.mxu1 %v2641_v47  ;;  %2669 = vmatpush3.bf16.msra.mxu0 %v2668_v33  ;;  %v1716_v47 = vld [vmem:[#allocation9 + $0x40] sm:$0xff]  ;;  %v1589_v33 = vrot.slane %v1349_v13, %v1588_v31  ;;  %v2146_v31 = vld [vmem:[%s3763_s24] ss:$0 sm:$0xff] }
 0x4db   : > { %2644 = vmatprep.subr.bf16.mxu1 %v2643_v52  ;;  %2671 = vmatprep.subr.bf16.mxu0 %v2670_v34  ;;  %v2684_v49 = vpack.c.bf16 %v1717_v48, %v1716_v47  ;;  %v1734_v52 = vld [vmem:[#allocation9 + $0xd0] sm:$0xff] }
 0x4dc   : > { %v2686_v57 = vpack.c.bf16 %v1735_v53, %v1734_v52  ;;  %v1824_v53 = vld [vmem:[#allocation11] sm:$0xff] }
 0x4de   : > { %2646 = vmatpush3.bf16.msra.mxu1 %v2645_v62  ;;  %2673 = vmatpush3.bf16.msra.mxu0 %v2672_v51  ;;  %v2688_v62 = vpack.c.bf16 %v1719_v59, %v1718_v50  ;;  %v1584_v51 = vpop.permute.xlu0 %1583  ;;  %v1826_v50 = vld [vmem:[#allocation11 + $0x10] sm:$0xff] }
 0x4df   : > { %2648 = vmatprep.subr.bf16.mxu1 %v2647_v15  ;;  %v1736_v15 = vld [vmem:[#allocation9 + $0xe0] sm:$0xff]  ;;  %v1590_v37 = vmul.f32 %v1589_v33, %v1584_v51 }
 0x4e0   : > { %v2690_v1 = vpack.c.bf16 %v1737_v63, %v1736_v15  ;;  %v1828_v15 = vld [vmem:[#allocation11 + $0x20] sm:$0xff]  ;;  %v1829_v63 = vld [vmem:[#allocation11 + $0x28] sm:$0xff] }
 0x4e2   : > { %2650 = vmatpush3.bf16.msra.mxu1 %v2649_v6  ;;  %v2692_v6 = vpack.c.bf16 %v1721_v5, %v1720_v2  ;;  %v1617_v0 = vpop.permute.xlu0 %1616  ;;  %v1830_v2 = vld [vmem:[#allocation11 + $0x30] sm:$0xff]  ;;  %v1831_v5 = vld [vmem:[#allocation11 + $0x38] sm:$0xff] }
 0x4e3   : > { %2652 = vmatprep.subr.bf16.mxu1 %v2651_v7  ;;  %v1738_v7 = vld [vmem:[#allocation9 + $0xf0] sm:$0xff] }
 0x4e4   : > { %v2694_v4 = vpack.c.bf16 %v1739_v8, %v1738_v7  ;;  %v2145_v8 = vld [vmem:[%s3762_s18] ss:$0 sm:$0xff] }
 0x4e6   : > { %2654 = vmatpush3.bf16.msra.mxu1 %v2653_v11  ;;  %v2696_v11 = vpack.c.bf16 %v1723_v10, %v1722_v9 }
 0x4e7   : > { %2656 = vmatprep.subr.bf16.mxu1 %v2655_v12  ;;  %v1357_v12 = vsub.s32 0, %v3455_v3 }
 0x4e9   : > { %v1358_v14 = vrot.slane %v1349_v13, %v1357_v12 }
 0x4ea   : > { %2658 = vmatpush3.bf16.msra.mxu1 %v2657_v42 }
 0x4eb   : > { %2660 = vmatprep.subr.bf16.mxu1 %v2659_v18  ;;  %v1353_v18 = vpop.permute.xlu1 %1352 }
 0x4ec   : > { %v1359_v19 = vmul.f32 %v1358_v14, %v1353_v18  ;;  %v1833_v14 = vld [vmem:[#allocation11 + $0x48] sm:$0xff] }
 0x4ee   : > { %2662 = vmatpush3.bf16.msra.mxu1 %v2661_v21 }
 0x4ef   : > { %2698 = vmatprep.subr.bf16.mxu1 %v3140_v55  ;;  %v1573_v28 = vpop.permute.xlu1 %1572 }
 0x4f1   : > { %1565 = vmatmul.mubr.f32.vlgmr.msra.gmra.mrb[8].mxu1 %v1251_v23 }
 0x4f2   : > { %2512 = vmatprep.mubr.msk.f32.mxu1 %vm3141_vm14, %v3142_v58  ;;  %v2674_v58 = vpack.c.bf16 %v1729_v35, %v1728_v43  ;;  %v1600_v35 = vrot.slane %v1349_v13, %v1599_v32 }
 0x4f3   : > { %v1595_v34 = vpop.permute.xlu1 %1594 }
 0x4f4   : > { %2675 = vmatprep.subr.bf16.mxu0 %v2674_v58  ;;  %v1579_v58 = vmul.f32 %v1578_v54, %v1573_v28  ;;  %v1601_v44 = vmul.f32 %v1600_v35, %v1595_v34 }
 0x4f5   : > { %2677 = vmatpush3.bf16.msra.mxu0 %v2676_v40 }
 0x4f6   : > { %2679 = vmatprep.subr.bf16.mxu0 %v2678_v41 }
 0x4f7   : > { %v1606_v41 = vpop.permute.xlu1 %1605 }
 0x4f8   : > { %v1612_v46 = vmul.f32 %v1611_v39, %v1606_v41 }
 0x4f9   : > { %2681 = vmatpush3.bf16.msra.mxu0 %v2680_v45  ;;  %v1622_v45 = vrot.slane %v1349_v13, %v1621_v38  ;;  %v1832_v13 = vld [vmem:[#allocation11 + $0x40] sm:$0xff] }
 0x4fa   : > { %2683 = vmatprep.subr.bf16.mxu0 %v2682_v60 }
 0x4fb   : > { %v1623_v48 = vmul.f32 %v1622_v45, %v1617_v0 }
 0x4fd   : > { %2685 = vmatpush3.bf16.msra.mxu0 %v2684_v49 }
 0x4fe   : > { %2687 = vmatprep.subr.bf16.mxu0 %v2686_v57  ;;  %v1825_v57 = vld [vmem:[#allocation11 + $0x8] sm:$0xff] }
 0x4ff   : > { %v2699_v59 = vpack.c.bf16 %v1825_v57, %v1824_v53 }
 0x501   : > { %2689 = vmatpush3.bf16.msra.mxu0 %v2688_v62  ;;  %v1827_v62 = vld [vmem:[#allocation11 + $0x18] sm:$0xff]  ;;  %2700 = vmatpush3.bf16.msra.mxu1 %v2699_v59 }
 0x502   : > { %2691 = vmatprep.subr.bf16.mxu0 %v2690_v1  ;;  %v2702_v3 = vpack.c.bf16 %v1827_v62, %v1826_v50  ;;  %2701 = vmatprep.subr.bf16.mxu1 %v3140_v55  ;;  %v2705_v1 = vpack.c.bf16 %v1829_v63, %v1828_v15 }
 0x505   : > { %2693 = vmatpush3.bf16.msra.mxu0 %v2692_v6  ;;  %2703 = vmatpush3.bf16.msra.mxu1 %v2702_v3  ;;  %v2708_v6 = vpack.c.bf16 %v1831_v5, %v1830_v2 }
 0x506   : > { %2695 = vmatprep.subr.bf16.mxu0 %v2694_v4  ;;  %2704 = vmatprep.subr.bf16.mxu1 %v3140_v55 }
 0x509   : > { %2697 = vmatpush3.bf16.msra.mxu0 %v2696_v11  ;;  %2706 = vmatpush3.bf16.msra.mxu1 %v2705_v1 }
 0x50a   : > { %2707 = vmatprep.subr.bf16.mxu1 %v3140_v55 }
 0x50d   : > { %2709 = vmatpush3.bf16.msra.mxu1 %v2708_v6 }
 0x50e   : > { %2710 = vmatprep.subr.bf16.mxu1 %v3140_v55 }
 0x5a4   : > { %v2234_v16 = vpop.f32.mrb[6].mxu1 }
 0x5a5   : > { %v2235_v17 = vpop.f32.mrb[7].mxu1 }
 0x5a6   : > { %v2236_v42 = vadd.f32 %v2235_v17, %v2234_v16  ;;  %v2711_v16 = vpack.c.bf16 %v1833_v14, %v1832_v13  ;;  %v1834_v17 = vld [vmem:[#allocation11 + $0x50] sm:$0xff] }
 0x5a8   : > { %v2269_v20 = vpop.f32.mrb[12].mxu0  ;;  %v1427_v22 = vadd.f32 %v2236_v42, %v1359_v19  ;;  %2712 = vmatpush3.bf16.msra.mxu1 %v2711_v16  ;;  %v1835_v42 = vld [vmem:[#allocation11 + $0x58] sm:$0xff]  ;;  %v1836_v19 = vld [vmem:[#allocation11 + $0x60] sm:$0xff] }
 0x5a9   : > { %v2270_v21 = vpop.f32.mrb[13].mxu0  ;;  %2713 = vmatprep.subr.bf16.mxu1 %v3140_v55  ;;  %v2714_v18 = vpack.c.bf16 %v1835_v42, %v1834_v17 }
 0x5aa   : > { %v2271_v23 = vadd.f32 %v2270_v21, %v2269_v20  ;;  %v1837_v20 = vld [vmem:[#allocation11 + $0x68] sm:$0xff] }
 0x5ab   : > { %v2717_v21 = vpack.c.bf16 %v1837_v20, %v1836_v19 }
 0x5ac   : > { %v1497_v24 = vadd.f32 %v2271_v23, %v1427_v22  ;;  %v1704_v26 = vpop.f32.mrb[14].mxu0  ;;  %2715 = vmatpush3.bf16.msra.mxu1 %v2714_v18  ;;  %v1838_v22 = vld [vmem:[#allocation11 + $0x70] sm:$0xff]  ;;  %v1839_v23 = vld [vmem:[#allocation11 + $0x78] sm:$0xff] }
 0x5ad   : > { %1811 = vmatprep.mubr.f32.mxu0 %v1704_v26  ;;  %v2479_v27 = vpop.f32.mrb[15].mxu0  ;;  %2716 = vmatprep.subr.bf16.mxu1 %v3140_v55 }
 0x5b0   : > { %2718 = vmatpush3.bf16.msra.mxu1 %v2717_v21 }
 0x5b1   : > { %2719 = vmatprep.subr.bf16.mxu1 %v3140_v55 }
 0x5c4   : > { %v2304_v25 = vpop.f32.mrb[8].mxu1 }
 0x5c5   : > { %v2305_v61 = vpop.f32.mrb[9].mxu1 }
 0x5c6   : > { %v2306_v43 = vadd.f32 %v2305_v61, %v2304_v25 }
 0x5c8   : > { %v1567_v36 = vadd.f32 %v2306_v43, %v1497_v24  ;;  %v2720_v24 = vpack.c.bf16 %v1839_v23, %v1838_v22 }
 0x5ca   : > { %v1580_v40 = vadd.f32 %v1579_v58, %v1567_v36  ;;  %2721 = vmatpush3.bf16.msra.mxu1 %v2720_v24 }
 0x5cc   : > { %v1591_v56 = vadd.f32 %v1590_v37, %v1580_v40 }
 0x5ce   : > { %v1602_v60 = vadd.f32 %v1601_v44, %v1591_v56 }
 0x5d0   : > { %v1613_v47 = vadd.f32 %v1612_v46, %v1602_v60 }
 0x5d2   : > { %v1624_v49 = vadd.f32 %v1623_v48, %v1613_v47 }
 0x5d4   : > { %v1625_v52 = vmul.f32 0.16666667, %v1624_v49 }
 0x5d6   : > { %1812 = vmatmul.mubr.f32.vlgmr.msra.gmra.mrb[16].mxu0 %v1625_v52 }
 0x6a9   : > { %v2342_v7 = vpop.f32.mrb[16].mxu0 }
 0x6aa   : > { %v2343_v4 = vpop.f32.mrb[17].mxu0 }
 0x6ab   : > { %v2344_v9 = vadd.f32 %v2343_v4, %v2342_v7 }
 0x6ad   : > { %v1814_v10 = vadd.f32 %v2344_v9, %v2145_v8 }
 0x6af   : > { %v1817_v11 = vmax.f32 %v1814_v10, 0.0 }
 0x6b1   : > { %v1818_v12 = vmul.f32 %v1817_v11, %v1817_v11 }
 0x6b3   : > { %1819 = vadd.xlane.f32.xlu1 %v1818_v12 }
 0x740   : > { %v1820_v26 = vpop.xlane.xlu1 %1819 }
 0x741   : > { %v1821_v27 = vmax.f32 %v1820_v26, 1e-24 }
 0x743   : > { %2878 = vrsqrt.f32 %v1821_v27 }
 0x74d   : > { %v2879_v28 = vpop.eup %2878 }
 0x74e   : > { %v1823_v29 = vmul.f32 %v2879_v28, %v1817_v11 }
 0x750   : > { %2513 = vmatmul.mubr.f32.vlgmr.msra.gmra.mrb[10].mxu1 %v1823_v29 }
 0x823   : > { %v1913_v32 = vpop.f32.mrb[10].mxu1 }
 0x824   : > { %v1914_v54 = vadd.f32 %v2146_v31, %v1913_v32  ;;  %v2514_v25 = vpop.f32.mrb[11].mxu1 }
 0x826   : > { %1917 = vst [vmem:[%s683_s12] sm:$0xff] %v1914_v54 }
 0x827 PF: > { %s3764_s22 = sld [smem:[#allocation23_spill]]  ;;  %s2148_s10 = sshll.u32 %s3114_s28, 7 }
 0x828   : > { %s3765_s14 = sld [smem:[#allocation35_spill]]  ;;  %s1932_s17 = sshll.u32 %s683_s12, 4  ;;  %s1933_s17 = int_to_ptr.vmem [resolvable:$true] %s1932_s17 }
 0x829   : > { %s1919_s16 = scalar_lea.sflag [#allocation5], %s681_s29  ;;  %s3020_s1 = scalar_lea.vmem %s1933_s17, 128 }
 0x82a   : > { %p3021_p1 = scmp.ne.s32.totalorder %s1933_s17, %s3020_s1  ;;  %s3145_s8 = smov [#allocation12]  }
 0x82b   : > { %s3024_s9 = sshll.u32 %s3145_s8, 4  ;;  %s3025_s9 = int_to_ptr.vmem [resolvable:$false] %s3024_s9 }
 0x82c   : > { %s3026_s27 = scalar_lea.vmem %s3025_s9, 256  ;;  %p3027_p7 = scmp.lt.s32.totalorder %s1933_s17, %s3025_s9 }
 0x82d   : > { %p3766_p4 = scmp.ne.s32.totalorder %s3764_s22, 0  ;;  %p3028_p8 = scmp.lt.s32.totalorder %s3026_s27, %s3020_s1 }
 0x82e   : > { %s3645_s19 = scalar_lea.hbm %s3765_s14, %s2148_s10 }
 0x82f   : > { %p3022_p5 = pnand %p3021_p1, %p3766_p4  ;;  %p3029_p11 = por %p3028_p8, %p3027_p7 }
 0x831   : > { %p3023_p6 = pneg %p3022_p5 }
 0x833   : > { %p3030_p12 = pnand %p3029_p11, %p3023_p6 }
 0x835   : > { %3033 = shalt.err (!%p3030_p12)
}
 0x836   : > { %s3034_s28 = scalar_lea.hbm %s3645_s19, 128  ;;  %s3038_s12 = scalar_lea.hbm %s3765_s14, 256 }
 0x837   : > { %p3035_p3 = scmp.ne.s32.totalorder %s3645_s19, %s3034_s28  ;;  %p3039_p9 = scmp.lt.u32.totalorder %s3645_s19, %s3765_s14 }
 0x838   : > { %p3040_p10 = scmp.lt.u32.totalorder %s3038_s12, %s3034_s28  ;;  %p3042_p1 = scmp.lt.u32.totalorder %s3034_s28, %s3645_s19 }
 0x839   : > { %p3036_p2 = pnand %p3035_p3, %p3766_p4 }
 0x83a   : > { %p3041_p13 = por %p3040_p10, %p3039_p9 }
 0x83b   : > { %p3037_p0 = pneg %p3036_p2 }
 0x83c   : > { %p3043_p5 = por %p3042_p1, %p3041_p13 }
 0x83e   : > { %p3044_p6 = pnand %p3043_p5, %p3037_p0 }
 0x840   : > { %3047 = shalt.err (!%p3044_p6)
}
 0x841   : > { %2746 = dma.vmem_to_hbm [thread:$0]  (%p3766_p4), %s1933_s17, 128, %s3645_s19, %s1919_s16  }
 0x842 PF: > { %s3767_s23 = sld [smem:[#allocation21_spill]]  ;;  %s3768_s0 = sld [smem:[#allocation17_spill]] }
 0x843   : > { %s3769_s24 = sld [smem:[#allocation25_spill]] }
 0x848   : > { %p2778_p7 = scmp.ge.s32.totalorder %s3767_s23, 2  ;;  %s1944_s10 = sand.u32 1, %s3768_s0  }
 0x849   : > { %p3770_p8 = scmp.ne.s32.totalorder %s3769_s24, 0  ;;  %s1945_s26 = scalar_lea.sflag [#allocation5], %s1944_s10 }
 0x84b   : > { %p2765_p11 = pnand %p2778_p7, %p3770_p8 }
 0x84d   : > { %3093 = dma.done.wait (!%p2765_p11), %s1945_s26, 128  }
 0x84e   : > { %3095 = vsyncadd (!%p2765_p11), %s1945_s26, 4294967168  ;;  %s33_s30 = sadd.s32 1, %s3767_s23   ;;  %s3771_s21 = sld [smem:[#allocation18_spill]] }
 0x84f   : > { %p30_p12 = scmp.ge.s32.totalorder %s33_s30, 8   ;;  %s3772_s26 = sld [smem:[#allocation26_spill]] }
 0x850   : > { %s3773_s27 = sld [smem:[#allocation19_spill]]  ;;  %s3774_s28 = sld [smem:[#allocation20_spill]] }
 0x851   : > { %s3775_s29 = sld [smem:[#allocation22_spill]]  ;;  %s3776_s0 = sld [smem:[#allocation24_spill]] }
 0x852   : > { %s3777_s24 = smov %s3102_s25  ;;  %32 = sbr.rel (!%p30_p12) target bundleno = 18 (0x12), region = 167 }
 0x854   : > { %s3778_s25 = smov %s3771_s21 }
 0x859   :  { %1950 = vsyncpa [#allocation4], 1 }
 0x85a   :  { %1952 = vsyncpa [#allocation4 + $0x1], 1 }
 0x85b   :  { %1953 = vsyncpa [#allocation7], 1 }
 0x85c   :  { %1954 = vsyncpa [#allocation10], 1 }
 0x85d   :  { %1955 = vsyncpa [#allocation5], 1 }
 0x85e   :  { %1957 = vsyncpa [#allocation5 + $0x1], 1 }

</bundles_post_ra>
